<compile_context>
chip_gen: v7x
topology: tpu7x:2x2x1
jax: 0.10.0
libtpu: 0.0.40
codegen_flags: <defaults>
</compile_context>

<pallas_src>
import jax
import jax.numpy as jnp
from jax.experimental import pallas as pl
from jax.experimental.pallas import tpu as pltpu


NUM_TAGS = 2   # hidden2tag = nn.Linear(linear_input_size, 2)
PACK = 64      # tokens packed per lane-row -> 2*PACK = 128 output lanes


def _round_up(x, m):
    return ((x + m - 1) // m) * m


def _segmenter_kernel(x_ref, w_ref, b_ref, o_ref):
    # x_ref: (TR, PACK*D)   packed encodings tile (f32 or bf16), fully dense
    # w_ref: (PACK*D, 128)  block-diagonal "difference" weights (same dtype)
    # b_ref: (1, 128)       interleaved bias differences (f32)
    # o_ref: (TR, 128)      lane-dense log-prob slab (f32)
    d = jnp.dot(x_ref[...], w_ref[...], preferred_element_type=jnp.float32)
    d = d + b_ref[...]
    # 2-class log-softmax: logp_t = -softplus(l_other - l_t), computed stably.
    sp = jnp.maximum(d, 0.0) + jnp.log(1.0 + jnp.exp(-jnp.abs(d)))
    o_ref[...] = (-sp).astype(o_ref.dtype)


def prepare_hidden2tag_params(weight, bias, *, stream_bf16=False):
    """Hoisted, once-per-model parameter folding.

    weight: (2, D) torch nn.Linear layout; bias: (2,).
    Returns:
      w_blk: (PACK*D, 2*PACK) block-diagonal difference weights
             (block p, col 2p holds w1-w0, col 2p+1 holds w0-w1)
      b_row: (1, 2*PACK) f32 interleaved bias differences.
    """
    weight = jnp.asarray(weight, jnp.float32)
    bias = jnp.asarray(bias, jnp.float32)
    d_feat = weight.shape[1]
    w_diff = weight[1] - weight[0]                              # (D,)
    cols = jnp.stack([w_diff, -w_diff], axis=1)                 # (D, 2)
    blk = jnp.einsum("pq,kt->pkqt",
                     jnp.eye(PACK, dtype=jnp.float32), cols)    # (P,D,P,2)
    w_blk = blk.reshape(PACK * d_feat, 2 * PACK)
    if stream_bf16:
        w_blk = w_blk.astype(jnp.bfloat16)
    b_diff = jnp.stack([bias[1] - bias[0], bias[0] - bias[1]])  # (2,)
    b_row = jnp.tile(b_diff, PACK).reshape(1, 2 * PACK).astype(jnp.float32)
    return w_blk, b_row


def _pick_grid(n, tile_rows):
    """Choose (packed-row tile, grid steps) for n tokens."""
    r_needed = max(1, pl.cdiv(n, PACK))
    tr = max(8, min(tile_rows, _round_up(r_needed, 8)))
    g = pl.cdiv(r_needed, tr)
    # Give v7x's two TensorCores both work when a large input fits one tile.
    if g == 1 and n >= 2048:
        g = 2
    # Re-balance the tile to minimise padding for this grid size.
    tr = _round_up(pl.cdiv(r_needed, g), 8)
    g = pl.cdiv(r_needed, tr)
    return tr, g


def tony_segmenter_forward(encodings, w_blk, b_row, *, tile_rows=256,
                           stream_bf16=False):
    """encodings: (N, D) float32; w_blk/b_row from prepare_hidden2tag_params.
    Returns (N, 2) float32 log-probabilities (== log_softmax(hidden2tag(x)))."""
    n, d_feat = encodings.shape
    assert w_blk.shape == (PACK * d_feat, 2 * PACK)
    assert b_row.shape == (1, 2 * PACK)

    tr, g = _pick_grid(n, tile_rows)
    r_pad = tr * g
    n_pad = r_pad * PACK

    x = encodings
    if stream_bf16:
        x = x.astype(jnp.bfloat16)
    w = w_blk.astype(x.dtype)

    if n_pad != n:
        x = jnp.pad(x, ((0, n_pad - n), (0, 0)))
    # Free, contiguous reshape: pack 64 tokens per lane-dense row.
    xp = x.reshape(r_pad, PACK * d_feat)

    out = pl.pallas_call(
        _segmenter_kernel,
        out_shape=jax.ShapeDtypeStruct((r_pad, 2 * PACK), jnp.float32),
        grid_spec=pltpu.PrefetchScalarGridSpec(
            num_scalar_prefetch=0,
            grid=(g,),
            in_specs=[
                pl.BlockSpec((tr, PACK * d_feat), lambda i: (i, 0)),  # tokens
                pl.BlockSpec((PACK * d_feat, 2 * PACK), lambda i: (0, 0)),
                pl.BlockSpec((1, 2 * PACK), lambda i: (0, 0)),        # bias
            ],
            out_specs=pl.BlockSpec((tr, 2 * PACK), lambda i: (i, 0)),
        ),
        compiler_params=pltpu.CompilerParams(
            dimension_semantics=("parallel",),
            vmem_limit_bytes=32 * 1024 * 1024,
        ),
    )(xp, w, b_row)

    # Free reshape back to the row-major (N, 2) layout, drop padding.
    out = out.reshape(r_pad * PACK, NUM_TAGS)
    return out[:n] if n_pad != n else out


def _reference_forward(encodings, weight, bias):
    logits = encodings @ weight.T + bias
    return jax.nn.log_softmax(logits, axis=1)


def _check(out, ref, atol, rtol, tag):
    assert out.shape == ref.shape, f"{tag}: shape mismatch"
    # TPU default matmul precision rounds f32 operands to bf16 in the MXU;
    # the kernel contracts with the folded (w1-w0) weights while the
    # reference contracts with w0/w1 separately, so the bf16 roundings do not
    # cancel exactly.  The resulting gap is bounded by a few 1e-3 for these
    # weight magnitudes, hence the tolerance below.
    assert jnp.allclose(out, ref, atol=atol, rtol=rtol), f"{tag}: value mismatch"
    # Self-consistency: the two class probabilities must sum to 1.
    psum = jnp.exp(out).sum(axis=1)
    assert jnp.allclose(psum, 1.0, atol=1e-4), f"{tag}: probs do not sum to 1"


if __name__ == "__main__":
    # Module config implied by defaults: hidden_dim=32 (small), bidirectional
    # LSTM -> linear_input_size = 2*hidden_dim = 64.  forward() consumes the
    # already-encoded sequence: encodings (seq_len, 64).
    seq_len = 8
    hidden_dim = 32
    linear_input_size = 2 * hidden_dim  # 64

    key = jax.random.PRNGKey(0)
    k_x, k_w, k_b, k_x2, k_x3 = jax.random.split(key, 5)

    encodings = jax.random.normal(k_x, (seq_len, linear_input_size),
                                  jnp.float32)
    bound = 1.0 / jnp.sqrt(linear_input_size)
    weight = jax.random.uniform(k_w, (NUM_TAGS, linear_input_size),
                                jnp.float32, minval=-bound, maxval=bound)
    bias = jax.random.uniform(k_b, (NUM_TAGS,), jnp.float32,
                              minval=-bound, maxval=bound)

    # Parameter folding hoisted (done once, not per forward call).
    w_blk, b_row = prepare_hidden2tag_params(weight, bias)

    # 1) Small input (single tile).
    out = jax.block_until_ready(tony_segmenter_forward(encodings, w_blk, b_row))
    ref = _reference_forward(encodings, weight, bias)
    assert out.shape == (seq_len, NUM_TAGS)
    _check(out, ref, atol=1e-2, rtol=1e-2, tag="small")

    # 2) Ragged N (not a multiple of 64 -> wrapper pads/slices).
    n2 = 13
    enc2 = jax.random.normal(k_x2, (n2, linear_input_size), jnp.float32)
    out2 = jax.block_until_ready(tony_segmenter_forward(enc2, w_blk, b_row))
    ref2 = _reference_forward(enc2, weight, bias)
    _check(out2, ref2, atol=1e-2, rtol=1e-2, tag="ragged")

    # 3) Larger input exercising the multi-step "parallel" grid path.
    n3 = 3000
    enc3 = jax.random.normal(k_x3, (n3, linear_input_size), jnp.float32)
    out3 = jax.block_until_ready(tony_segmenter_forward(enc3, w_blk, b_row))
    ref3 = _reference_forward(enc3, weight, bias)
    _check(out3, ref3, atol=1e-2, rtol=1e-2, tag="large")

    # 4) Optional bf16 streaming path (halves HBM read traffic); looser tol.
    out4 = jax.block_until_ready(
        tony_segmenter_forward(encodings, w_blk, b_row, stream_bf16=True))
    assert jnp.allclose(out4, ref, atol=5e-2, rtol=5e-2), "bf16 mismatch"

    print("KERNEL_OK")
</pallas_src>

<mosaic_0001>
module attributes {stable_mosaic.version = 11 : i64} {
  func.func @_segmenter_kernel(%arg0: i32, %arg1: memref<8x4096xf32, #tpu.memory_space<vmem>>, %arg2: memref<4096x128xf32, #tpu.memory_space<vmem>>, %arg3: memref<1x128xf32, #tpu.memory_space<vmem>>, %arg4: memref<8x128xf32, #tpu.memory_space<vmem>>) attributes {dimension_semantics = [#tpu.dimension_semantics<parallel>], iteration_bounds = array<i64: 1>, scalar_prefetch = 0 : i64, scratch_operands = 0 : i64, tpu.core_type = #tpu.core_type<tc>, window_params = [{transform_indices = @transform_0, window_bounds = array<i64: 8, 4096>}, {pipeline_mode = #tpu.pipeline_mode<synchronous>, transform_indices = @transform_1, window_bounds = array<i64: 4096, 128>}, {pipeline_mode = #tpu.pipeline_mode<synchronous>, transform_indices = @transform_2, window_bounds = array<i64: 1, 128>}, {transform_indices = @transform_3, window_bounds = array<i64: 8, 128>}]} {
    %c0 = arith.constant 0 : index
    %c0_0 = arith.constant 0 : index
    %0 = vector.load %arg1[%c0, %c0_0] : memref<8x4096xf32, #tpu.memory_space<vmem>>, vector<8x4096xf32>
    %c0_1 = arith.constant 0 : index
    %c0_2 = arith.constant 0 : index
    %1 = vector.load %arg2[%c0_1, %c0_2] : memref<4096x128xf32, #tpu.memory_space<vmem>>, vector<4096x128xf32>
    %cst = arith.constant dense<0.000000e+00> : vector<8x128xf32>
    %2 = tpu.matmul %0, %1, %cst {dimension_numbers = #tpu.dot_dimension_numbers<[1], [0], [0], [1], [0, 0, 1, 1], [], []>} : vector<8x4096xf32>, vector<4096x128xf32>, vector<8x128xf32> -> vector<8x128xf32>
    %c0_3 = arith.constant 0 : index
    %c0_4 = arith.constant 0 : index
    %3 = vector.load %arg3[%c0_3, %c0_4] : memref<1x128xf32, #tpu.memory_space<vmem>>, vector<1x128xf32>
    %4 = vector.broadcast %3 : vector<1x128xf32> to vector<8x128xf32>
    %5 = arith.addf %2, %4 : vector<8x128xf32>
    %cst_5 = arith.constant 0.000000e+00 : f32
    %6 = vector.broadcast %cst_5 : f32 to vector<8x128xf32>
    %7 = arith.maximumf %5, %6 : vector<8x128xf32>
    %8 = math.absf %5 : vector<8x128xf32>
    %cst_6 = arith.constant 0.000000e+00 : f32
    %9 = vector.broadcast %cst_6 : f32 to vector<8x128xf32>
    %10 = arith.subf %9, %8 : vector<8x128xf32>
    %11 = math.exp %10 : vector<8x128xf32>
    %cst_7 = arith.constant 1.000000e+00 : f32
    %12 = vector.broadcast %cst_7 : f32 to vector<8x128xf32>
    %13 = arith.addf %12, %11 : vector<8x128xf32>
    %14 = math.log %13 : vector<8x128xf32>
    %15 = arith.addf %7, %14 : vector<8x128xf32>
    %cst_8 = arith.constant 0.000000e+00 : f32
    %16 = vector.broadcast %cst_8 : f32 to vector<8x128xf32>
    %17 = arith.subf %16, %15 : vector<8x128xf32>
    %c0_9 = arith.constant 0 : index
    %c0_10 = arith.constant 0 : index
    %18 = vector.load %arg4[%c0_9, %c0_10] : memref<8x128xf32, #tpu.memory_space<vmem>>, vector<8x128xf32>
    tpu.vector_store %arg4[%c0_9, %c0_10], %17 {strides = array<i32>} : memref<8x128xf32, #tpu.memory_space<vmem>>, vector<8x128xf32>,
    return
  }
  func.func @transform_0(%arg0: i32) -> (i32, i32) {
    %c0_i32 = arith.constant 0 : i32
    %c0_i32_0 = arith.constant 0 : i32
    return %arg0, %c0_i32 : i32, i32
  }
  func.func @transform_1(%arg0: i32) -> (i32, i32) {
    %c0_i32 = arith.constant 0 : i32
    %c0_i32_0 = arith.constant 0 : i32
    %c0_i32_1 = arith.constant 0 : i32
    return %c0_i32, %c0_i32_0 : i32, i32
  }
  func.func @transform_2(%arg0: i32) -> (i32, i32) {
    %c0_i32 = arith.constant 0 : i32
    %c0_i32_0 = arith.constant 0 : i32
    %c0_i32_1 = arith.constant 0 : i32
    return %c0_i32, %c0_i32_0 : i32, i32
  }
  func.func @transform_3(%arg0: i32) -> (i32, i32) {
    %c0_i32 = arith.constant 0 : i32
    %c0_i32_0 = arith.constant 0 : i32
    return %arg0, %c0_i32 : i32, i32
  }
}

</mosaic_0001>

<bundles_post_ra>
// kernel: tpu_custom_call.1
= control target key start
LH: loop header
LB: loop body
LE: loop exit
PB: predicated region body
PF: predicated region fallthrough
CT: control target
= control target key end

     0   :  { %8 = vsyncpa [#allocation3], 0  ;;  %s3001_s0 = inlined_call_operand.hbm [shape: f32[8,4096], index: 0, kind: input, shape index: {}]   ;;  %s3002_s1 = inlined_call_operand.hbm [shape: f32[4096,128], index: 1, kind: input, shape index: {}]   ;;  %s3003_s2 = inlined_call_operand.hbm [shape: f32[1,128], index: 2, kind: input, shape index: {}]   ;;  %s3004_s3 = inlined_call_operand.hbm [shape: f32[8,128], index: 3, kind: output, shape index: {}]  }
   0x1   :  { %9 = vsyncpa [#allocation6], 0 }
   0x2   :  { %10 = vsyncpa [#allocation4], 0  ;;  %s2927_s12 = smov [#allocation5]   ;;  %s2833_s16 = scalar_lea.hbm %s3002_s1, 65536 }
   0x3   :  { %s26_s13 = sshll.u32 %s2927_s12, 4  ;;  %p2834_p0 = scmp.ne.s32.totalorder %s3002_s1, %s2833_s16  ;;  %s27_s13 = int_to_ptr.vmem [resolvable:$true] %s26_s13 }
   0x4   :  { %p2837_p1 = scmp.lt.u32.totalorder %s2833_s16, %s3002_s1 }
   0x6   :  { %p2839_p2 = pnand %p2837_p1, %p2834_p0 }
   0x8   :  { %2842 = shalt.err (!%p2839_p2)
}
   0x9   :  { %s2843_s21 = scalar_lea.vmem %s27_s13, 65536  ;;  %p2848_p4 = scmp.lt.s32.totalorder %s27_s13, %s27_s13 }
   0xa   :  { %p2844_p3 = scmp.ne.s32.totalorder %s27_s13, %s2843_s21  ;;  %p2849_p5 = scmp.lt.s32.totalorder %s2843_s21, %s2843_s21 }
   0xc   :  { %p2850_p6 = por %p2849_p5, %p2848_p4 }
   0xe   :  { %p2851_p7 = pnand %p2850_p6, %p2844_p3 }
  0x10   :  { %2854 = shalt.err (!%p2851_p7)
}
  0x11   :  { %s2928_s22 = smov 128   ;;  %s2929_s23 = smov 8  }
  0x12   :  { %32 = dma.hbm_to_vmem [thread:$0]  %s3002_s1, 65536, %s27_s13, [#allocation6], %s2928_s22, %s2928_s22, %s2929_s23  }
  0x13   :  { %s2930_s26 = smov [#allocation2]   ;;  %s2931_s28 = smov [#allocation7]  }
  0x14   :  { %s17_s27 = sshll.u32 %s2930_s26, 4  ;;  %s39_s29 = sshll.u32 %s2931_s28, 4  ;;  %s18_s27 = int_to_ptr.vmem [resolvable:$true] %s17_s27  ;;  %s40_s29 = int_to_ptr.vmem [resolvable:$true] %s39_s29 }
  0x15   :  { %s2855_s5 = scalar_lea.hbm %s3001_s0, 4096 }
  0x16   :  { %p2856_p8 = scmp.ne.s32.totalorder %s3001_s0, %s2855_s5  ;;  %p2859_p9 = scmp.lt.u32.totalorder %s2855_s5, %s3001_s0 }
  0x18   :  { %p2861_p10 = pnand %p2859_p9, %p2856_p8 }
  0x1a   :  { %2864 = shalt.err (!%p2861_p10)
}
  0x1b   :  { %s2865_s1 = scalar_lea.vmem %s18_s27, 4096  ;;  %p2870_p12 = scmp.lt.s32.totalorder %s18_s27, %s18_s27 }
  0x1c   :  { %p2866_p11 = scmp.ne.s32.totalorder %s18_s27, %s2865_s1  ;;  %p2871_p13 = scmp.lt.s32.totalorder %s2865_s1, %s2865_s1 }
  0x1e   :  { %p2872_p0 = por %p2871_p13, %p2870_p12 }
  0x20   :  { %p2873_p1 = pnand %p2872_p0, %p2866_p11 }
  0x22   :  { %2876 = shalt.err (!%p2873_p1)
}
  0x23   :  { %20 = dma.hbm_to_vmem [thread:$0]  %s3001_s0, 4096, %s18_s27, [#allocation3]  }
  0x24   :  { %s2877_s14 = scalar_lea.hbm %s3003_s2, 16 }
  0x25   :  { %p2878_p2 = scmp.ne.s32.totalorder %s3003_s2, %s2877_s14  ;;  %p2881_p3 = scmp.lt.u32.totalorder %s2877_s14, %s3003_s2 }
  0x27   :  { %p2883_p4 = pnand %p2881_p3, %p2878_p2 }
  0x29   :  { %2886 = shalt.err (!%p2883_p4)
}
  0x2a   :  { %s2887_s19 = scalar_lea.vmem %s40_s29, 16  ;;  %s2891_s20 = scalar_lea.vmem %s40_s29, 32 }
  0x2b   :  { %p2888_p5 = scmp.ne.s32.totalorder %s40_s29, %s2887_s19  ;;  %p2892_p6 = scmp.lt.s32.totalorder %s40_s29, %s40_s29 }
  0x2c   :  { %p2893_p7 = scmp.lt.s32.totalorder %s2891_s20, %s2887_s19 }
  0x2e   :  { %p2894_p8 = por %p2893_p7, %p2892_p6 }
  0x30   :  { %p2895_p9 = pnand %p2894_p8, %p2888_p5 }
  0x32   :  { %2898 = shalt.err (!%p2895_p9)
}
  0x33   :  { %42 = dma.hbm_to_vmem [thread:$0]  %s3003_s2, 16, %s40_s29, [#allocation6]  }
  0x34   :  { %2921 = dma.done.wait [#allocation3], 4096  }
  0x35   :  { %2922 = vsyncadd [#allocation3], 4294963200 }
  0x36   :  { %2923 = dma.done.wait [#allocation6], 65552  }
  0x37   :  { %2924 = vsyncadd [#allocation6], 4294901744  ;;  %v100_v0 = vld [vmem:[#allocation5 + $0x80] sm:$0xff]  ;;  %v101_v1 = vld [vmem:[#allocation5 + $0x88] sm:$0xff]  ;;  %s2932_s2 = smov [#allocation8]  }
  0x38   :  { %v84_v2 = vld [vmem:[#allocation5] sm:$0xff]  ;;  %v2311_v3 = vpack.c.bf16 %v101_v1, %v100_v0  ;;  %v85_v4 = vld [vmem:[#allocation5 + $0x8] sm:$0xff]  ;;  %v102_v11 = vld [vmem:[#allocation5 + $0x90] sm:$0xff]  ;;  %s1740_s22 = sshll.u32 %s2932_s2, 4  ;;  %s1741_s22 = int_to_ptr.vmem [resolvable:$true] %s1740_s22 }
  0x39   :  { %v132_v5 = vld [vmem:[#allocation5 + $0x180] sm:$0xff]  ;;  %v133_v6 = vld [vmem:[#allocation5 + $0x188] sm:$0xff]  ;;  %v2313_v7 = vpack.c.bf16 %v85_v4, %v84_v2  ;;  %v103_v13 = vld [vmem:[#allocation5 + $0x98] sm:$0xff]  ;;  %s2899_s23 = scalar_lea.vmem %s1741_s22, 128  ;;  %p2904_p11 = scmp.lt.s32.totalorder %s1741_s22, %s1741_s22 }
  0x3a   :  { %v2343_v8 = vpack.c.bf16 %v133_v6, %v132_v5  ;;  %v116_v9 = vld [vmem:[#allocation5 + $0x100] sm:$0xff]  ;;  %v117_v10 = vld [vmem:[#allocation5 + $0x108] sm:$0xff]  ;;  %2312 = vmatprep.subr.bf16.mxu0 %v2311_v3  ;;  %v86_v14 = vld [vmem:[#allocation5 + $0x10] sm:$0xff]  ;;  %v2315_v16 = vpack.c.bf16 %v103_v13, %v102_v11  ;;  %p2900_p10 = scmp.ne.s32.totalorder %s1741_s22, %s2899_s23  ;;  %p2905_p12 = scmp.lt.s32.totalorder %s2899_s23, %s2899_s23 }
  0x3b   :  { %v2345_v12 = vpack.c.bf16 %v117_v10, %v116_v9  ;;  %v87_v15 = vld [vmem:[#allocation5 + $0x18] sm:$0xff]  ;;  %2314 = vmatpush3.bf16.msra.mxu0 %v2313_v7  ;;  %v134_v18 = vld [vmem:[#allocation5 + $0x190] sm:$0xff]  ;;  %v104_v23 = vld [vmem:[#allocation5 + $0xa0] sm:$0xff] }
  0x3c   :  { %2344 = vmatprep.subr.bf16.mxu1 %v2343_v8  ;;  %v2317_v17 = vpack.c.bf16 %v87_v15, %v86_v14  ;;  %v135_v19 = vld [vmem:[#allocation5 + $0x198] sm:$0xff]  ;;  %v118_v20 = vld [vmem:[#allocation5 + $0x110] sm:$0xff]  ;;  %v105_v24 = vld [vmem:[#allocation5 + $0xa8] sm:$0xff]  ;;  %2316 = vmatprep.subr.bf16.mxu0 %v2315_v16  ;;  %p2906_p13 = por %p2905_p12, %p2904_p11 }
  0x3d   :  { %2346 = vmatpush3.bf16.msra.mxu1 %v2345_v12  ;;  %v2347_v21 = vpack.c.bf16 %v135_v19, %v134_v18  ;;  %v119_v22 = vld [vmem:[#allocation5 + $0x118] sm:$0xff]  ;;  %v2319_v26 = vpack.c.bf16 %v105_v24, %v104_v23  ;;  %v88_v27 = vld [vmem:[#allocation5 + $0x20] sm:$0xff]  ;;  %v89_v28 = vld [vmem:[#allocation5 + $0x28] sm:$0xff] }
  0x3e   :  { %v2349_v25 = vpack.c.bf16 %v119_v22, %v118_v20  ;;  %v136_v29 = vld [vmem:[#allocation5 + $0x1a0] sm:$0xff]  ;;  %v137_v30 = vld [vmem:[#allocation5 + $0x1a8] sm:$0xff]  ;;  %v2321_v33 = vpack.c.bf16 %v89_v28, %v88_v27  ;;  %v106_v35 = vld [vmem:[#allocation5 + $0xb0] sm:$0xff]  ;;  %p2907_p0 = pnand %p2906_p13, %p2900_p10 }
  0x3f   :  { %2348 = vmatprep.subr.bf16.mxu1 %v2347_v21  ;;  %v120_v31 = vld [vmem:[#allocation5 + $0x120] sm:$0xff]  ;;  %v121_v32 = vld [vmem:[#allocation5 + $0x128] sm:$0xff]  ;;  %2318 = vmatpush3.bf16.msra.mxu0 %v2317_v17  ;;  %v2351_v34 = vpack.c.bf16 %v137_v30, %v136_v29  ;;  %v107_v36 = vld [vmem:[#allocation5 + $0xb8] sm:$0xff] }
  0x40   :  { %v90_v37 = vld [vmem:[#allocation5 + $0x30] sm:$0xff]  ;;  %2320 = vmatprep.subr.bf16.mxu0 %v2319_v26  ;;  %v2353_v38 = vpack.c.bf16 %v121_v32, %v120_v31  ;;  %v2323_v39 = vpack.c.bf16 %v107_v36, %v106_v35  ;;  %v91_v40 = vld [vmem:[#allocation5 + $0x38] sm:$0xff]  ;;  %v108_v46 = vld [vmem:[#allocation5 + $0xc0] sm:$0xff] }
  0x41   :  { %2350 = vmatpush3.bf16.msra.mxu1 %v2349_v25  ;;  %v138_v41 = vld [vmem:[#allocation5 + $0x1b0] sm:$0xff]  ;;  %v139_v42 = vld [vmem:[#allocation5 + $0x1b8] sm:$0xff]  ;;  %v109_v47 = vld [vmem:[#allocation5 + $0xc8] sm:$0xff]  ;;  %v2325_v48 = vpack.c.bf16 %v91_v40, %v90_v37 }
  0x42   :  { %2352 = vmatprep.subr.bf16.mxu1 %v2351_v34  ;;  %v2355_v43 = vpack.c.bf16 %v139_v42, %v138_v41  ;;  %v122_v44 = vld [vmem:[#allocation5 + $0x130] sm:$0xff]  ;;  %v123_v45 = vld [vmem:[#allocation5 + $0x138] sm:$0xff]  ;;  %v140_v49 = vld [vmem:[#allocation5 + $0x1c0] sm:$0xff]  ;;  %v2327_v52 = vpack.c.bf16 %v109_v47, %v108_v46 }
  0x43   :  { %2322 = vmatpush3.bf16.msra.mxu0 %v2321_v33  ;;  %v141_v50 = vld [vmem:[#allocation5 + $0x1c8] sm:$0xff]  ;;  %v2357_v51 = vpack.c.bf16 %v123_v45, %v122_v44  ;;  %v92_v53 = vld [vmem:[#allocation5 + $0x40] sm:$0xff]  ;;  %v110_v58 = vld [vmem:[#allocation5 + $0xd0] sm:$0xff] }
  0x44   :  { %2324 = vmatprep.subr.bf16.mxu0 %v2323_v39  ;;  %v93_v54 = vld [vmem:[#allocation5 + $0x48] sm:$0xff]  ;;  %v124_v55 = vld [vmem:[#allocation5 + $0x140] sm:$0xff]  ;;  %v2359_v56 = vpack.c.bf16 %v141_v50, %v140_v49  ;;  %v111_v59 = vld [vmem:[#allocation5 + $0xd8] sm:$0xff] }
  0x45   :  { %2354 = vmatpush3.bf16.msra.mxu1 %v2353_v38  ;;  %v125_v57 = vld [vmem:[#allocation5 + $0x148] sm:$0xff]  ;;  %v142_v60 = vld [vmem:[#allocation5 + $0x1d0] sm:$0xff]  ;;  %v143_v61 = vld [vmem:[#allocation5 + $0x1d8] sm:$0xff]  ;;  %v2329_v62 = vpack.c.bf16 %v93_v54, %v92_v53  ;;  %v2331_v0 = vpack.c.bf16 %v111_v59, %v110_v58 }
  0x46   :  { %2356 = vmatprep.subr.bf16.mxu1 %v2355_v43  ;;  %v2361_v63 = vpack.c.bf16 %v125_v57, %v124_v55  ;;  %v94_v1 = vld [vmem:[#allocation5 + $0x50] sm:$0xff]  ;;  %v95_v2 = vld [vmem:[#allocation5 + $0x58] sm:$0xff]  ;;  %v2363_v4 = vpack.c.bf16 %v143_v61, %v142_v60  ;;  %v112_v6 = vld [vmem:[#allocation5 + $0xe0] sm:$0xff] }
  0x47   :  { %2326 = vmatpush3.bf16.msra.mxu0 %v2325_v48  ;;  %v126_v3 = vld [vmem:[#allocation5 + $0x150] sm:$0xff]  ;;  %v127_v5 = vld [vmem:[#allocation5 + $0x158] sm:$0xff]  ;;  %v113_v7 = vld [vmem:[#allocation5 + $0xe8] sm:$0xff]  ;;  %v2333_v10 = vpack.c.bf16 %v95_v2, %v94_v1 }
  0x48   :  { %2328 = vmatprep.subr.bf16.mxu0 %v2327_v52  ;;  %v144_v8 = vld [vmem:[#allocation5 + $0x1e0] sm:$0xff]  ;;  %v145_v9 = vld [vmem:[#allocation5 + $0x1e8] sm:$0xff]  ;;  %v2365_v13 = vpack.c.bf16 %v127_v5, %v126_v3  ;;  %v2335_v14 = vpack.c.bf16 %v113_v7, %v112_v6  ;;  %v114_v19 = vld [vmem:[#allocation5 + $0xf0] sm:$0xff] }
  0x49   :  { %2358 = vmatpush3.bf16.msra.mxu1 %v2357_v51  ;;  %v96_v11 = vld [vmem:[#allocation5 + $0x60] sm:$0xff]  ;;  %v97_v12 = vld [vmem:[#allocation5 + $0x68] sm:$0xff]  ;;  %v2367_v18 = vpack.c.bf16 %v145_v9, %v144_v8  ;;  %v115_v20 = vld [vmem:[#allocation5 + $0xf8] sm:$0xff] }
  0x4a   :  { %2360 = vmatprep.subr.bf16.mxu1 %v2359_v56  ;;  %v128_v15 = vld [vmem:[#allocation5 + $0x160] sm:$0xff]  ;;  %v129_v16 = vld [vmem:[#allocation5 + $0x168] sm:$0xff]  ;;  %v55_v21 = vld [vmem:[#allocation2 + $0x18] sm:$0xff]  ;;  %v2337_v24 = vpack.c.bf16 %v97_v12, %v96_v11  ;;  %v2339_v26 = vpack.c.bf16 %v115_v20, %v114_v19 }
  0x4b   :  { %2330 = vmatpush3.bf16.msra.mxu0 %v2329_v62  ;;  %v53_v17 = vld [vmem:[#allocation2 + $0x8] sm:$0xff]  ;;  %v146_v22 = vld [vmem:[#allocation5 + $0x1f0] sm:$0xff]  ;;  %v147_v23 = vld [vmem:[#allocation5 + $0x1f8] sm:$0xff]  ;;  %737 = vmatprep.mubr.f32.mxu1 %v55_v21  ;;  %v2369_v25 = vpack.c.bf16 %v129_v16, %v128_v15 }
  0x4c   :  { %2332 = vmatprep.subr.bf16.mxu0 %v2331_v0  ;;  %667 = vmatprep.mubr.f32.mxu0 %v53_v17  ;;  %v98_v27 = vld [vmem:[#allocation5 + $0x70] sm:$0xff]  ;;  %v99_v28 = vld [vmem:[#allocation5 + $0x78] sm:$0xff]  ;;  %v2371_v30 = vpack.c.bf16 %v147_v23, %v146_v22  ;;  %v164_v32 = vld [vmem:[#allocation5 + $0x280] sm:$0xff] }
  0x4d   :  { %2362 = vmatpush3.bf16.msra.mxu1 %v2361_v63  ;;  %v130_v29 = vld [vmem:[#allocation5 + $0x170] sm:$0xff]  ;;  %v131_v31 = vld [vmem:[#allocation5 + $0x178] sm:$0xff]  ;;  %v165_v33 = vld [vmem:[#allocation5 + $0x288] sm:$0xff]  ;;  %v2341_v36 = vpack.c.bf16 %v99_v28, %v98_v27 }
  0x4e   :  { %2364 = vmatprep.subr.bf16.mxu1 %v2363_v4  ;;  %v196_v34 = vld [vmem:[#allocation5 + $0x380] sm:$0xff]  ;;  %v197_v35 = vld [vmem:[#allocation5 + $0x388] sm:$0xff]  ;;  %v2373_v37 = vpack.c.bf16 %v131_v31, %v130_v29  ;;  %v2375_v38 = vpack.c.bf16 %v165_v33, %v164_v32  ;;  %v166_v44 = vld [vmem:[#allocation5 + $0x290] sm:$0xff] }
  0x4f   :  { %2334 = vmatpush3.bf16.msra.mxu0 %v2333_v10  ;;  %v148_v39 = vld [vmem:[#allocation5 + $0x200] sm:$0xff]  ;;  %v149_v40 = vld [vmem:[#allocation5 + $0x208] sm:$0xff]  ;;  %v2407_v42 = vpack.c.bf16 %v197_v35, %v196_v34  ;;  %v167_v45 = vld [vmem:[#allocation5 + $0x298] sm:$0xff] }
  0x50   :  { %2336 = vmatprep.subr.bf16.mxu0 %v2335_v14  ;;  %v180_v41 = vld [vmem:[#allocation5 + $0x300] sm:$0xff]  ;;  %v181_v43 = vld [vmem:[#allocation5 + $0x308] sm:$0xff]  ;;  %v198_v46 = vld [vmem:[#allocation5 + $0x390] sm:$0xff]  ;;  %v2377_v49 = vpack.c.bf16 %v149_v40, %v148_v39  ;;  %v2379_v52 = vpack.c.bf16 %v167_v45, %v166_v44 }
  0x51   :  { %2366 = vmatpush3.bf16.msra.mxu1 %v2365_v13  ;;  %v199_v47 = vld [vmem:[#allocation5 + $0x398] sm:$0xff]  ;;  %v52_v48 = vld [vmem:[#allocation2] sm:$0xff]  ;;  %v54_v50 = vld [vmem:[#allocation2 + $0x10] sm:$0xff]  ;;  %v2409_v51 = vpack.c.bf16 %v181_v43, %v180_v41 }
  0x52   :  { %2368 = vmatprep.subr.bf16.mxu1 %v2367_v18  ;;  %v150_v53 = vld [vmem:[#allocation5 + $0x210] sm:$0xff]  ;;  %v151_v54 = vld [vmem:[#allocation5 + $0x218] sm:$0xff]  ;;  %v2411_v56 = vpack.c.bf16 %v199_v47, %v198_v46  ;;  %v168_v58 = vld [vmem:[#allocation5 + $0x2a0] sm:$0xff] }
  0x53   :  { %2338 = vmatpush3.bf16.msra.mxu0 %v2337_v24  ;;  %v182_v55 = vld [vmem:[#allocation5 + $0x310] sm:$0xff]  ;;  %v183_v57 = vld [vmem:[#allocation5 + $0x318] sm:$0xff]  ;;  %v169_v59 = vld [vmem:[#allocation5 + $0x2a8] sm:$0xff]  ;;  %v2381_v62 = vpack.c.bf16 %v151_v54, %v150_v53 }
  0x54   :  { %2340 = vmatprep.subr.bf16.mxu0 %v2339_v26  ;;  %v200_v60 = vld [vmem:[#allocation5 + $0x3a0] sm:$0xff]  ;;  %v201_v61 = vld [vmem:[#allocation5 + $0x3a8] sm:$0xff]  ;;  %v2413_v63 = vpack.c.bf16 %v183_v57, %v182_v55  ;;  %v2383_v0 = vpack.c.bf16 %v169_v59, %v168_v58  ;;  %v170_v6 = vld [vmem:[#allocation5 + $0x2b0] sm:$0xff] }
  0x55   :  { %2370 = vmatpush3.bf16.msra.mxu1 %v2369_v25  ;;  %v152_v1 = vld [vmem:[#allocation5 + $0x220] sm:$0xff]  ;;  %v153_v2 = vld [vmem:[#allocation5 + $0x228] sm:$0xff]  ;;  %v2415_v4 = vpack.c.bf16 %v201_v61, %v200_v60  ;;  %v171_v7 = vld [vmem:[#allocation5 + $0x2b8] sm:$0xff] }
  0x56   :  { %2372 = vmatprep.subr.bf16.mxu1 %v2371_v30  ;;  %v184_v3 = vld [vmem:[#allocation5 + $0x320] sm:$0xff]  ;;  %v185_v5 = vld [vmem:[#allocation5 + $0x328] sm:$0xff]  ;;  %v202_v8 = vld [vmem:[#allocation5 + $0x3b0] sm:$0xff]  ;;  %v2385_v10 = vpack.c.bf16 %v153_v2, %v152_v1  ;;  %v2387_v12 = vpack.c.bf16 %v171_v7, %v170_v6 }
  0x57   :  { %2342 = vmatpush3.bf16.msra.mxu0 %v2341_v36  ;;  %v203_v9 = vld [vmem:[#allocation5 + $0x3b8] sm:$0xff]  ;;  %v2417_v11 = vpack.c.bf16 %v185_v5, %v184_v3  ;;  %v154_v13 = vld [vmem:[#allocation5 + $0x230] sm:$0xff]  ;;  %v172_v18 = vld [vmem:[#allocation5 + $0x2c0] sm:$0xff] }
  0x58   :  { %2376 = vmatprep.subr.bf16.mxu0 %v2375_v38  ;;  %v155_v14 = vld [vmem:[#allocation5 + $0x238] sm:$0xff]  ;;  %v186_v15 = vld [vmem:[#allocation5 + $0x330] sm:$0xff]  ;;  %v2419_v16 = vpack.c.bf16 %v203_v9, %v202_v8  ;;  %v173_v19 = vld [vmem:[#allocation5 + $0x2c8] sm:$0xff] }
  0x59   :  { %2374 = vmatpush3.bf16.msra.mxu1 %v2373_v37  ;;  %v187_v17 = vld [vmem:[#allocation5 + $0x338] sm:$0xff]  ;;  %v204_v20 = vld [vmem:[#allocation5 + $0x3c0] sm:$0xff]  ;;  %v205_v21 = vld [vmem:[#allocation5 + $0x3c8] sm:$0xff]  ;;  %v2389_v22 = vpack.c.bf16 %v155_v14, %v154_v13  ;;  %v2391_v26 = vpack.c.bf16 %v173_v19, %v172_v18 }
  0x5a   :  { %2408 = vmatprep.subr.bf16.mxu1 %v2407_v42  ;;  %668 = vmatmul.mubr.f32.vlgmr.msra.gmra.mrb[0].mxu0 %v52_v48  ;;  %v156_v23 = vld [vmem:[#allocation5 + $0x240] sm:$0xff]  ;;  %v57_v24 = vld [vmem:[#allocation2 + $0x28] sm:$0xff]  ;;  %v2421_v25 = vpack.c.bf16 %v187_v17, %v186_v15  ;;  %v59_v29 = vld [vmem:[#allocation2 + $0x38] sm:$0xff]  ;;  %v2423_v30 = vpack.c.bf16 %v205_v21, %v204_v20 }
  0x5b   :  { %2378 = vmatpush3.bf16.msra.mxu0 %v2377_v49  ;;  %v157_v27 = vld [vmem:[#allocation5 + $0x248] sm:$0xff]  ;;  %v188_v28 = vld [vmem:[#allocation5 + $0x340] sm:$0xff]  ;;  %v174_v32 = vld [vmem:[#allocation5 + $0x2d0] sm:$0xff]  ;;  %807 = vmatprep.mubr.f32.mxu0 %v57_v24 }
  0x5c   :  { %738 = vmatmul.mubr.f32.vlgmr.msra.gmra.mrb[0].mxu1 %v54_v50  ;;  %2380 = vmatprep.subr.bf16.mxu0 %v2379_v52  ;;  %v189_v31 = vld [vmem:[#allocation5 + $0x348] sm:$0xff]  ;;  %v175_v33 = vld [vmem:[#allocation5 + $0x2d8] sm:$0xff]  ;;  %v206_v34 = vld [vmem:[#allocation5 + $0x3d0] sm:$0xff]  ;;  %v2393_v36 = vpack.c.bf16 %v157_v27, %v156_v23 }
  0x5d   :  { %2410 = vmatpush3.bf16.msra.mxu1 %v2409_v51  ;;  %v207_v35 = vld [vmem:[#allocation5 + $0x3d8] sm:$0xff]  ;;  %877 = vmatprep.mubr.f32.mxu1 %v59_v29  ;;  %v2425_v37 = vpack.c.bf16 %v189_v31, %v188_v28  ;;  %v2395_v38 = vpack.c.bf16 %v175_v33, %v174_v32  ;;  %v158_v39 = vld [vmem:[#allocation5 + $0x250] sm:$0xff]  ;;  %v176_v44 = vld [vmem:[#allocation5 + $0x2e0] sm:$0xff] }
  0x5e   :  { %2412 = vmatprep.subr.bf16.mxu1 %v2411_v56  ;;  %v159_v40 = vld [vmem:[#allocation5 + $0x258] sm:$0xff]  ;;  %v190_v41 = vld [vmem:[#allocation5 + $0x350] sm:$0xff]  ;;  %v2427_v42 = vpack.c.bf16 %v207_v35, %v206_v34  ;;  %v177_v45 = vld [vmem:[#allocation5 + $0x2e8] sm:$0xff] }
  0x5f   :  { %2382 = vmatpush3.bf16.msra.mxu0 %v2381_v62  ;;  %v191_v43 = vld [vmem:[#allocation5 + $0x358] sm:$0xff]  ;;  %v208_v46 = vld [vmem:[#allocation5 + $0x3e0] sm:$0xff]  ;;  %v209_v47 = vld [vmem:[#allocation5 + $0x3e8] sm:$0xff]  ;;  %v2397_v48 = vpack.c.bf16 %v159_v40, %v158_v39  ;;  %v2399_v50 = vpack.c.bf16 %v177_v45, %v176_v44 }
  0x60   :  { %2384 = vmatprep.subr.bf16.mxu0 %v2383_v0  ;;  %v2429_v49 = vpack.c.bf16 %v191_v43, %v190_v41  ;;  %v160_v51 = vld [vmem:[#allocation5 + $0x260] sm:$0xff]  ;;  %v161_v52 = vld [vmem:[#allocation5 + $0x268] sm:$0xff]  ;;  %v2431_v54 = vpack.c.bf16 %v209_v47, %v208_v46  ;;  %v178_v56 = vld [vmem:[#allocation5 + $0x2f0] sm:$0xff] }
  0x61   :  { %2414 = vmatpush3.bf16.msra.mxu1 %v2413_v63  ;;  %v192_v53 = vld [vmem:[#allocation5 + $0x360] sm:$0xff]  ;;  %v193_v55 = vld [vmem:[#allocation5 + $0x368] sm:$0xff]  ;;  %v179_v57 = vld [vmem:[#allocation5 + $0x2f8] sm:$0xff]  ;;  %v2401_v60 = vpack.c.bf16 %v161_v52, %v160_v51 }
  0x62   :  { %2416 = vmatprep.subr.bf16.mxu1 %v2415_v4  ;;  %v210_v58 = vld [vmem:[#allocation5 + $0x3f0] sm:$0xff]  ;;  %v211_v59 = vld [vmem:[#allocation5 + $0x3f8] sm:$0xff]  ;;  %v2433_v61 = vpack.c.bf16 %v193_v55, %v192_v53  ;;  %v2403_v62 = vpack.c.bf16 %v179_v57, %v178_v56  ;;  %v228_v4 = vld [vmem:[#allocation5 + $0x480] sm:$0xff] }
  0x63   :  { %2386 = vmatpush3.bf16.msra.mxu0 %v2385_v10  ;;  %v162_v63 = vld [vmem:[#allocation5 + $0x270] sm:$0xff]  ;;  %v163_v0 = vld [vmem:[#allocation5 + $0x278] sm:$0xff]  ;;  %v2435_v2 = vpack.c.bf16 %v211_v59, %v210_v58  ;;  %v229_v5 = vld [vmem:[#allocation5 + $0x488] sm:$0xff] }
  0x64   :  { %2388 = vmatprep.subr.bf16.mxu0 %v2387_v12  ;;  %v194_v1 = vld [vmem:[#allocation5 + $0x370] sm:$0xff]  ;;  %v195_v3 = vld [vmem:[#allocation5 + $0x378] sm:$0xff]  ;;  %v260_v6 = vld [vmem:[#allocation5 + $0x580] sm:$0xff]  ;;  %v2405_v8 = vpack.c.bf16 %v163_v0, %v162_v63  ;;  %v2439_v10 = vpack.c.bf16 %v229_v5, %v228_v4 }
  0x65   :  { %2418 = vmatpush3.bf16.msra.mxu1 %v2417_v11  ;;  %v261_v7 = vld [vmem:[#allocation5 + $0x588] sm:$0xff]  ;;  %v2437_v9 = vpack.c.bf16 %v195_v3, %v194_v1  ;;  %v212_v11 = vld [vmem:[#allocation5 + $0x400] sm:$0xff]  ;;  %v231_v17 = vld [vmem:[#allocation5 + $0x498] sm:$0xff] }
  0x66   :  { %2420 = vmatprep.subr.bf16.mxu1 %v2419_v16  ;;  %v213_v12 = vld [vmem:[#allocation5 + $0x408] sm:$0xff]  ;;  %v244_v13 = vld [vmem:[#allocation5 + $0x500] sm:$0xff]  ;;  %v2471_v14 = vpack.c.bf16 %v261_v7, %v260_v6  ;;  %v230_v16 = vld [vmem:[#allocation5 + $0x490] sm:$0xff] }
  0x67   :  { %2390 = vmatpush3.bf16.msra.mxu0 %v2389_v22  ;;  %v245_v15 = vld [vmem:[#allocation5 + $0x508] sm:$0xff]  ;;  %v262_v18 = vld [vmem:[#allocation5 + $0x590] sm:$0xff]  ;;  %v263_v19 = vld [vmem:[#allocation5 + $0x598] sm:$0xff]  ;;  %v2441_v21 = vpack.c.bf16 %v213_v12, %v212_v11  ;;  %v2443_v24 = vpack.c.bf16 %v231_v17, %v230_v16 }
  0x68   :  { %2392 = vmatprep.subr.bf16.mxu0 %v2391_v26  ;;  %v56_v20 = vld [vmem:[#allocation2 + $0x20] sm:$0xff]  ;;  %v58_v22 = vld [vmem:[#allocation2 + $0x30] sm:$0xff]  ;;  %v2473_v23 = vpack.c.bf16 %v245_v15, %v244_v13  ;;  %v215_v26 = vld [vmem:[#allocation5 + $0x418] sm:$0xff]  ;;  %v2475_v28 = vpack.c.bf16 %v263_v19, %v262_v18 }
  0x69   :  { %2422 = vmatpush3.bf16.msra.mxu1 %v2421_v25  ;;  %v214_v25 = vld [vmem:[#allocation5 + $0x410] sm:$0xff]  ;;  %v247_v29 = vld [vmem:[#allocation5 + $0x518] sm:$0xff]  ;;  %v233_v31 = vld [vmem:[#allocation5 + $0x4a8] sm:$0xff] }
  0x6a   :  { %2424 = vmatprep.subr.bf16.mxu1 %v2423_v30  ;;  %v246_v27 = vld [vmem:[#allocation5 + $0x510] sm:$0xff]  ;;  %v232_v30 = vld [vmem:[#allocation5 + $0x4a0] sm:$0xff]  ;;  %v265_v33 = vld [vmem:[#allocation5 + $0x5a8] sm:$0xff]  ;;  %v2445_v35 = vpack.c.bf16 %v215_v26, %v214_v25 }
  0x6b   :  { %2394 = vmatpush3.bf16.msra.mxu0 %v2393_v36  ;;  %v264_v32 = vld [vmem:[#allocation5 + $0x5a0] sm:$0xff]  ;;  %v61_v34 = vld [vmem:[#allocation2 + $0x48] sm:$0xff]  ;;  %v63_v36 = vld [vmem:[#allocation2 + $0x58] sm:$0xff] }
  0x6c   :  { %2396 = vmatprep.subr.bf16.mxu0 %v2395_v38  ;;  %v2447_v38 = vpack.c.bf16 %v233_v31, %v232_v30  ;;  %v216_v39 = vld [vmem:[#allocation5 + $0x420] sm:$0xff]  ;;  %v217_v40 = vld [vmem:[#allocation5 + $0x428] sm:$0xff]  ;;  %v234_v44 = vld [vmem:[#allocation5 + $0x4b0] sm:$0xff] }
  0x6d   :  { %2426 = vmatpush3.bf16.msra.mxu1 %v2425_v37  ;;  %v2477_v37 = vpack.c.bf16 %v247_v29, %v246_v27  ;;  %v248_v41 = vld [vmem:[#allocation5 + $0x520] sm:$0xff]  ;;  %v249_v43 = vld [vmem:[#allocation5 + $0x528] sm:$0xff]  ;;  %v235_v45 = vld [vmem:[#allocation5 + $0x4b8] sm:$0xff] }
  0x6e   :  { %2428 = vmatprep.subr.bf16.mxu1 %v2427_v42  ;;  %v2479_v42 = vpack.c.bf16 %v265_v33, %v264_v32  ;;  %v266_v46 = vld [vmem:[#allocation5 + $0x5b0] sm:$0xff]  ;;  %v267_v47 = vld [vmem:[#allocation5 + $0x5b8] sm:$0xff]  ;;  %v236_v56 = vld [vmem:[#allocation5 + $0x4c0] sm:$0xff] }
  0x6f   :  { %2398 = vmatpush3.bf16.msra.mxu0 %v2397_v48  ;;  %v2449_v48 = vpack.c.bf16 %v217_v40, %v216_v39  ;;  %v218_v51 = vld [vmem:[#allocation5 + $0x430] sm:$0xff]  ;;  %v219_v52 = vld [vmem:[#allocation5 + $0x438] sm:$0xff]  ;;  %v237_v57 = vld [vmem:[#allocation5 + $0x4c8] sm:$0xff] }
  0x70   :  { %2400 = vmatprep.subr.bf16.mxu0 %v2399_v50  ;;  %v2451_v50 = vpack.c.bf16 %v235_v45, %v234_v44  ;;  %v250_v53 = vld [vmem:[#allocation5 + $0x530] sm:$0xff]  ;;  %v251_v55 = vld [vmem:[#allocation5 + $0x538] sm:$0xff]  ;;  %v268_v58 = vld [vmem:[#allocation5 + $0x5c0] sm:$0xff] }
  0x71   :  { %2430 = vmatpush3.bf16.msra.mxu1 %v2429_v49  ;;  %v2481_v49 = vpack.c.bf16 %v249_v43, %v248_v41  ;;  %v269_v59 = vld [vmem:[#allocation5 + $0x5c8] sm:$0xff]  ;;  %v220_v63 = vld [vmem:[#allocation5 + $0x440] sm:$0xff]  ;;  %v238_v4 = vld [vmem:[#allocation5 + $0x4d0] sm:$0xff] }
  0x72   :  { %2432 = vmatprep.subr.bf16.mxu1 %v2431_v54  ;;  %v2483_v54 = vpack.c.bf16 %v267_v47, %v266_v46  ;;  %v221_v0 = vld [vmem:[#allocation5 + $0x448] sm:$0xff]  ;;  %v252_v1 = vld [vmem:[#allocation5 + $0x540] sm:$0xff]  ;;  %v239_v5 = vld [vmem:[#allocation5 + $0x4d8] sm:$0xff] }
  0x73   :  { %2402 = vmatpush3.bf16.msra.mxu0 %v2401_v60  ;;  %v2453_v60 = vpack.c.bf16 %v219_v52, %v218_v51  ;;  %v253_v3 = vld [vmem:[#allocation5 + $0x548] sm:$0xff]  ;;  %v270_v6 = vld [vmem:[#allocation5 + $0x5d0] sm:$0xff]  ;;  %v271_v7 = vld [vmem:[#allocation5 + $0x5d8] sm:$0xff] }
  0x74   :  { %2404 = vmatprep.subr.bf16.mxu0 %v2403_v62  ;;  %v2455_v62 = vpack.c.bf16 %v237_v57, %v236_v56  ;;  %v222_v11 = vld [vmem:[#allocation5 + $0x450] sm:$0xff]  ;;  %v223_v12 = vld [vmem:[#allocation5 + $0x458] sm:$0xff]  ;;  %v240_v16 = vld [vmem:[#allocation5 + $0x4e0] sm:$0xff] }
  0x75   :  { %2434 = vmatpush3.bf16.msra.mxu1 %v2433_v61  ;;  %v2485_v61 = vpack.c.bf16 %v251_v55, %v250_v53  ;;  %v254_v13 = vld [vmem:[#allocation5 + $0x550] sm:$0xff]  ;;  %v255_v15 = vld [vmem:[#allocation5 + $0x558] sm:$0xff]  ;;  %v241_v17 = vld [vmem:[#allocation5 + $0x4e8] sm:$0xff] }
  0x76   :  { %2436 = vmatprep.subr.bf16.mxu1 %v2435_v2  ;;  %v2487_v2 = vpack.c.bf16 %v269_v59, %v268_v58  ;;  %v272_v18 = vld [vmem:[#allocation5 + $0x5e0] sm:$0xff]  ;;  %v273_v19 = vld [vmem:[#allocation5 + $0x5e8] sm:$0xff]  ;;  %v243_v29 = vld [vmem:[#allocation5 + $0x4f8] sm:$0xff] }
  0x77   :  { %2406 = vmatpush3.bf16.msra.mxu0 %v2405_v8  ;;  %v2457_v8 = vpack.c.bf16 %v221_v0, %v220_v63  ;;  %v256_v25 = vld [vmem:[#allocation5 + $0x560] sm:$0xff]  ;;  %v2495_v26 = vpack.c.bf16 %v273_v19, %v272_v18  ;;  %v257_v27 = vld [vmem:[#allocation5 + $0x568] sm:$0xff]  ;;  %v274_v30 = vld [vmem:[#allocation5 + $0x5f0] sm:$0xff] }
  0x78   :  { %2440 = vmatprep.subr.bf16.mxu0 %v2439_v10  ;;  %v2459_v10 = vpack.c.bf16 %v239_v5, %v238_v4  ;;  %v275_v31 = vld [vmem:[#allocation5 + $0x5f8] sm:$0xff]  ;;  %v2497_v33 = vpack.c.bf16 %v257_v27, %v256_v25  ;;  %v292_v40 = vld [vmem:[#allocation5 + $0x680] sm:$0xff]  ;;  %v293_v41 = vld [vmem:[#allocation5 + $0x688] sm:$0xff] }
  0x79   :  { %2438 = vmatpush3.bf16.msra.mxu1 %v2437_v9  ;;  %v2489_v9 = vpack.c.bf16 %v253_v3, %v252_v1  ;;  %v259_v39 = vld [vmem:[#allocation5 + $0x578] sm:$0xff]  ;;  %v325_v43 = vld [vmem:[#allocation5 + $0x788] sm:$0xff]  ;;  %v2503_v46 = vpack.c.bf16 %v293_v41, %v292_v40  ;;  %v276_v47 = vld [vmem:[#allocation5 + $0x600] sm:$0xff] }
  0x7a   :  { %2472 = vmatprep.subr.bf16.mxu1 %v2471_v14  ;;  %808 = vmatmul.mubr.f32.vlgmr.msra.gmra.mrb[2].mxu0 %v56_v20  ;;  %v2491_v14 = vpack.c.bf16 %v271_v7, %v270_v6  ;;  %v2461_v20 = vpack.c.bf16 %v223_v12, %v222_v11  ;;  %v309_v51 = vld [vmem:[#allocation5 + $0x708] sm:$0xff]  ;;  %v294_v52 = vld [vmem:[#allocation5 + $0x690] sm:$0xff]  ;;  %v295_v53 = vld [vmem:[#allocation5 + $0x698] sm:$0xff] }
  0x7b   :  { %2442 = vmatpush3.bf16.msra.mxu0 %v2441_v21  ;;  %947 = vmatprep.mubr.f32.mxu0 %v61_v34  ;;  %v2493_v21 = vpack.c.bf16 %v255_v15, %v254_v13  ;;  %v327_v55 = vld [vmem:[#allocation5 + $0x798] sm:$0xff]  ;;  %v60_v56 = vld [vmem:[#allocation2 + $0x40] sm:$0xff]  ;;  %v62_v58 = vld [vmem:[#allocation2 + $0x50] sm:$0xff] }
  0x7c   :  { %878 = vmatmul.mubr.f32.vlgmr.msra.gmra.mrb[2].mxu1 %v58_v22  ;;  %2444 = vmatprep.subr.bf16.mxu0 %v2443_v24  ;;  %v2463_v22 = vpack.c.bf16 %v241_v17, %v240_v16  ;;  %v225_v24 = vld [vmem:[#allocation5 + $0x468] sm:$0xff]  ;;  %v310_v63 = vld [vmem:[#allocation5 + $0x710] sm:$0xff]  ;;  %v311_v1 = vld [vmem:[#allocation5 + $0x718] sm:$0xff] }
  0x7d   :  { %2474 = vmatpush3.bf16.msra.mxu1 %v2473_v23  ;;  %1017 = vmatprep.mubr.f32.mxu1 %v63_v36  ;;  %v224_v23 = vld [vmem:[#allocation5 + $0x460] sm:$0xff]  ;;  %v227_v36 = vld [vmem:[#allocation5 + $0x478] sm:$0xff]  ;;  %v297_v3 = vld [vmem:[#allocation5 + $0x6a8] sm:$0xff] }
  0x7e   :  { %2476 = vmatprep.subr.bf16.mxu1 %v2475_v28  ;;  %v242_v28 = vld [vmem:[#allocation5 + $0x4f0] sm:$0xff]  ;;  %v2465_v32 = vpack.c.bf16 %v225_v24, %v224_v23  ;;  %v328_v4 = vld [vmem:[#allocation5 + $0x7a0] sm:$0xff]  ;;  %v329_v5 = vld [vmem:[#allocation5 + $0x7a8] sm:$0xff] }
  0x7f   :  { %2446 = vmatpush3.bf16.msra.mxu0 %v2445_v35  ;;  %v2467_v34 = vpack.c.bf16 %v243_v29, %v242_v28  ;;  %v226_v35 = vld [vmem:[#allocation5 + $0x470] sm:$0xff]  ;;  %v65_v6 = vld [vmem:[#allocation2 + $0x68] sm:$0xff]  ;;  %v280_v11 = vld [vmem:[#allocation5 + $0x620] sm:$0xff] }
  0x80   :  { %2448 = vmatprep.subr.bf16.mxu0 %v2447_v38  ;;  %v2499_v38 = vpack.c.bf16 %v275_v31, %v274_v30  ;;  %v2469_v44 = vpack.c.bf16 %v227_v36, %v226_v35  ;;  %v281_v12 = vld [vmem:[#allocation5 + $0x628] sm:$0xff]  ;;  %v312_v13 = vld [vmem:[#allocation5 + $0x720] sm:$0xff]  ;;  %v298_v16 = vld [vmem:[#allocation5 + $0x6b0] sm:$0xff] }
  0x81   :  { %2478 = vmatpush3.bf16.msra.mxu1 %v2477_v37  ;;  %v258_v37 = vld [vmem:[#allocation5 + $0x570] sm:$0xff]  ;;  %v313_v15 = vld [vmem:[#allocation5 + $0x728] sm:$0xff]  ;;  %v299_v17 = vld [vmem:[#allocation5 + $0x6b8] sm:$0xff] }
  0x82   :  { %2480 = vmatprep.subr.bf16.mxu1 %v2479_v42  ;;  %v324_v42 = vld [vmem:[#allocation5 + $0x780] sm:$0xff]  ;;  %v2501_v45 = vpack.c.bf16 %v259_v39, %v258_v37  ;;  %v330_v18 = vld [vmem:[#allocation5 + $0x7b0] sm:$0xff]  ;;  %v331_v19 = vld [vmem:[#allocation5 + $0x7b8] sm:$0xff] }
  0x83   :  { %2450 = vmatpush3.bf16.msra.mxu0 %v2449_v48  ;;  %v277_v48 = vld [vmem:[#allocation5 + $0x608] sm:$0xff]  ;;  %v282_v23 = vld [vmem:[#allocation5 + $0x630] sm:$0xff]  ;;  %v283_v24 = vld [vmem:[#allocation5 + $0x638] sm:$0xff] }
  0x84   :  { %2452 = vmatprep.subr.bf16.mxu0 %v2451_v50  ;;  %v2535_v50 = vpack.c.bf16 %v325_v43, %v324_v42  ;;  %v2505_v57 = vpack.c.bf16 %v277_v48, %v276_v47  ;;  %v314_v25 = vld [vmem:[#allocation5 + $0x730] sm:$0xff]  ;;  %v315_v27 = vld [vmem:[#allocation5 + $0x738] sm:$0xff]  ;;  %v300_v28 = vld [vmem:[#allocation5 + $0x6c0] sm:$0xff] }
  0x85   :  { %2482 = vmatpush3.bf16.msra.mxu1 %v2481_v49  ;;  %v308_v49 = vld [vmem:[#allocation5 + $0x700] sm:$0xff]  ;;  %v301_v29 = vld [vmem:[#allocation5 + $0x6c8] sm:$0xff]  ;;  %v302_v40 = vld [vmem:[#allocation5 + $0x6d0] sm:$0xff] }
  0x86   :  { %2484 = vmatprep.subr.bf16.mxu1 %v2483_v54  ;;  %v326_v54 = vld [vmem:[#allocation5 + $0x790] sm:$0xff]  ;;  %v2537_v59 = vpack.c.bf16 %v309_v51, %v308_v49  ;;  %v332_v30 = vld [vmem:[#allocation5 + $0x7c0] sm:$0xff]  ;;  %v333_v31 = vld [vmem:[#allocation5 + $0x7c8] sm:$0xff] }
  0x87   :  { %2454 = vmatpush3.bf16.msra.mxu0 %v2453_v60  ;;  %v2507_v60 = vpack.c.bf16 %v295_v53, %v294_v52  ;;  %v2539_v0 = vpack.c.bf16 %v327_v55, %v326_v54  ;;  %v284_v35 = vld [vmem:[#allocation5 + $0x640] sm:$0xff]  ;;  %v285_v36 = vld [vmem:[#allocation5 + $0x648] sm:$0xff]  ;;  %v303_v41 = vld [vmem:[#allocation5 + $0x6d8] sm:$0xff] }
  0x88   :  { %2456 = vmatprep.subr.bf16.mxu0 %v2455_v62  ;;  %v279_v62 = vld [vmem:[#allocation5 + $0x618] sm:$0xff]  ;;  %v316_v37 = vld [vmem:[#allocation5 + $0x740] sm:$0xff]  ;;  %v317_v39 = vld [vmem:[#allocation5 + $0x748] sm:$0xff] }
  0x89   :  { %2486 = vmatpush3.bf16.msra.mxu1 %v2485_v61  ;;  %v278_v61 = vld [vmem:[#allocation5 + $0x610] sm:$0xff]  ;;  %v335_v43 = vld [vmem:[#allocation5 + $0x7d8] sm:$0xff]  ;;  %v304_v52 = vld [vmem:[#allocation5 + $0x6e0] sm:$0xff] }
  0x8a   :  { %2488 = vmatprep.subr.bf16.mxu1 %v2487_v2  ;;  %v296_v2 = vld [vmem:[#allocation5 + $0x6a0] sm:$0xff]  ;;  %v2509_v7 = vpack.c.bf16 %v279_v62, %v278_v61  ;;  %v334_v42 = vld [vmem:[#allocation5 + $0x7d0] sm:$0xff]  ;;  %v287_v48 = vld [vmem:[#allocation5 + $0x658] sm:$0xff] }
  0x8b   :  { %2458 = vmatpush3.bf16.msra.mxu0 %v2457_v8  ;;  %v67_v8 = vld [vmem:[#allocation2 + $0x78] sm:$0xff]  ;;  %v286_v47 = vld [vmem:[#allocation5 + $0x650] sm:$0xff]  ;;  %v305_v53 = vld [vmem:[#allocation5 + $0x6e8] sm:$0xff] }
  0x8c   :  { %2460 = vmatprep.subr.bf16.mxu0 %v2459_v10  ;;  %v2511_v10 = vpack.c.bf16 %v297_v3, %v296_v2  ;;  %v318_v49 = vld [vmem:[#allocation5 + $0x750] sm:$0xff]  ;;  %v319_v51 = vld [vmem:[#allocation5 + $0x758] sm:$0xff]  ;;  %v336_v54 = vld [vmem:[#allocation5 + $0x7e0] sm:$0xff] }
  0x8d   :  { %2490 = vmatpush3.bf16.msra.mxu1 %v2489_v9  ;;  %v2541_v9 = vpack.c.bf16 %v311_v1, %v310_v63  ;;  %v337_v55 = vld [vmem:[#allocation5 + $0x7e8] sm:$0xff]  ;;  %v320_v61 = vld [vmem:[#allocation5 + $0x760] sm:$0xff]  ;;  %v307_v1 = vld [vmem:[#allocation5 + $0x6f8] sm:$0xff] }
  0x8e   :  { %2492 = vmatprep.subr.bf16.mxu1 %v2491_v14  ;;  %v2543_v14 = vpack.c.bf16 %v329_v5, %v328_v4  ;;  %v2559_v62 = vpack.c.bf16 %v337_v55, %v336_v54  ;;  %v321_v63 = vld [vmem:[#allocation5 + $0x768] sm:$0xff]  ;;  %v338_v2 = vld [vmem:[#allocation5 + $0x7f0] sm:$0xff]  ;;  %v339_v3 = vld [vmem:[#allocation5 + $0x7f8] sm:$0xff] }
  0x8f   :  { %2462 = vmatpush3.bf16.msra.mxu0 %v2461_v20  ;;  %v2513_v20 = vpack.c.bf16 %v281_v12, %v280_v11  ;;  %v2561_v5 = vpack.c.bf16 %v321_v63, %v320_v61  ;;  %v323_v11 = vld [vmem:[#allocation5 + $0x778] sm:$0xff]  ;;  %v356_v12 = vld [vmem:[#allocation5 + $0x880] sm:$0xff]  ;;  %v394_v54 = vld [vmem:[#allocation5 + $0x9b0] sm:$0xff] }
  0x90   :  { %2464 = vmatprep.subr.bf16.mxu0 %v2463_v22  ;;  %v2515_v22 = vpack.c.bf16 %v299_v17, %v298_v16  ;;  %v395_v55 = vld [vmem:[#allocation5 + $0x9b8] sm:$0xff]  ;;  %v378_v61 = vld [vmem:[#allocation5 + $0x930] sm:$0xff] }
  0x91   :  { %2494 = vmatpush3.bf16.msra.mxu1 %v2493_v21  ;;  %v2545_v21 = vpack.c.bf16 %v313_v15, %v312_v13  ;;  %v357_v13 = vld [vmem:[#allocation5 + $0x888] sm:$0xff]  ;;  %v379_v63 = vld [vmem:[#allocation5 + $0x938] sm:$0xff] }
  0x92   :  { %2496 = vmatprep.subr.bf16.mxu1 %v2495_v26  ;;  %v2547_v26 = vpack.c.bf16 %v331_v19, %v330_v18  ;;  %v389_v15 = vld [vmem:[#allocation5 + $0x988] sm:$0xff]  ;;  %v2567_v18 = vpack.c.bf16 %v357_v13, %v356_v12  ;;  %v340_v19 = vld [vmem:[#allocation5 + $0x800] sm:$0xff]  ;;  %v366_v12 = vld [vmem:[#allocation5 + $0x8d0] sm:$0xff] }
  0x93   :  { %2466 = vmatpush3.bf16.msra.mxu0 %v2465_v32  ;;  %v2517_v32 = vpack.c.bf16 %v283_v24, %v282_v23  ;;  %v373_v23 = vld [vmem:[#allocation5 + $0x908] sm:$0xff]  ;;  %v358_v24 = vld [vmem:[#allocation5 + $0x890] sm:$0xff]  ;;  %v367_v13 = vld [vmem:[#allocation5 + $0x8d8] sm:$0xff] }
  0x94   :  { %2468 = vmatprep.subr.bf16.mxu0 %v2467_v34  ;;  %v2519_v34 = vpack.c.bf16 %v301_v29, %v300_v28  ;;  %v64_v28 = vld [vmem:[#allocation2 + $0x60] sm:$0xff] }
  0x95   :  { %2498 = vmatpush3.bf16.msra.mxu1 %v2497_v33  ;;  %v2549_v33 = vpack.c.bf16 %v315_v27, %v314_v25  ;;  %v359_v25 = vld [vmem:[#allocation5 + $0x898] sm:$0xff] }
  0x96   :  { %2500 = vmatprep.subr.bf16.mxu1 %v2499_v38  ;;  %v2551_v38 = vpack.c.bf16 %v333_v31, %v332_v30  ;;  %v391_v27 = vld [vmem:[#allocation5 + $0x998] sm:$0xff]  ;;  %v66_v30 = vld [vmem:[#allocation2 + $0x70] sm:$0xff] }
  0x97   :  { %2470 = vmatpush3.bf16.msra.mxu0 %v2469_v44  ;;  %v2521_v44 = vpack.c.bf16 %v285_v36, %v284_v35  ;;  %v374_v35 = vld [vmem:[#allocation5 + $0x910] sm:$0xff] }
  0x98   :  { %2504 = vmatprep.subr.bf16.mxu0 %v2503_v46  ;;  %v2523_v46 = vpack.c.bf16 %v303_v41, %v302_v40  ;;  %v392_v40 = vld [vmem:[#allocation5 + $0x9a0] sm:$0xff]  ;;  %v393_v41 = vld [vmem:[#allocation5 + $0x9a8] sm:$0xff] }
  0x99   :  { %2502 = vmatpush3.bf16.msra.mxu1 %v2501_v45  ;;  %v2553_v45 = vpack.c.bf16 %v317_v39, %v316_v37  ;;  %v375_v37 = vld [vmem:[#allocation5 + $0x918] sm:$0xff]  ;;  %v361_v39 = vld [vmem:[#allocation5 + $0x8a8] sm:$0xff] }
  0x9a   :  { %2536 = vmatprep.subr.bf16.mxu1 %v2535_v50  ;;  %948 = vmatmul.mubr.f32.vlgmr.msra.gmra.mrb[4].mxu0 %v60_v56  ;;  %v2555_v50 = vpack.c.bf16 %v335_v43, %v334_v42  ;;  %v2525_v56 = vpack.c.bf16 %v287_v48, %v286_v47  ;;  %v69_v42 = vld [vmem:[#allocation2 + $0x88] sm:$0xff]  ;;  %v344_v47 = vld [vmem:[#allocation5 + $0x820] sm:$0xff] }
  0x9b   :  { %2506 = vmatpush3.bf16.msra.mxu0 %v2505_v57  ;;  %1087 = vmatprep.mubr.f32.mxu0 %v65_v6  ;;  %v2557_v57 = vpack.c.bf16 %v319_v51, %v318_v49  ;;  %v345_v48 = vld [vmem:[#allocation5 + $0x828] sm:$0xff]  ;;  %v376_v49 = vld [vmem:[#allocation5 + $0x920] sm:$0xff] }
  0x9c   :  { %1018 = vmatmul.mubr.f32.vlgmr.msra.gmra.mrb[4].mxu1 %v62_v58  ;;  %2508 = vmatprep.subr.bf16.mxu0 %v2507_v60  ;;  %v2527_v58 = vpack.c.bf16 %v305_v53, %v304_v52  ;;  %v289_v60 = vld [vmem:[#allocation5 + $0x668] sm:$0xff]  ;;  %v362_v52 = vld [vmem:[#allocation5 + $0x8b0] sm:$0xff]  ;;  %v363_v53 = vld [vmem:[#allocation5 + $0x8b8] sm:$0xff] }
  0x9d   :  { %2538 = vmatpush3.bf16.msra.mxu1 %v2537_v59  ;;  %1157 = vmatprep.mubr.f32.mxu1 %v67_v8  ;;  %v288_v59 = vld [vmem:[#allocation5 + $0x660] sm:$0xff]  ;;  %v291_v8 = vld [vmem:[#allocation5 + $0x678] sm:$0xff]  ;;  %v377_v51 = vld [vmem:[#allocation5 + $0x928] sm:$0xff] }
  0x9e   :  { %2540 = vmatprep.subr.bf16.mxu1 %v2539_v0  ;;  %v306_v0 = vld [vmem:[#allocation5 + $0x6f0] sm:$0xff]  ;;  %v2529_v4 = vpack.c.bf16 %v289_v60, %v288_v59  ;;  %v347_v60 = vld [vmem:[#allocation5 + $0x838] sm:$0xff] }
  0x9f   :  { %2510 = vmatpush3.bf16.msra.mxu0 %v2509_v7  ;;  %v2531_v6 = vpack.c.bf16 %v307_v1, %v306_v0  ;;  %v290_v7 = vld [vmem:[#allocation5 + $0x670] sm:$0xff]  ;;  %v364_v0 = vld [vmem:[#allocation5 + $0x8c0] sm:$0xff]  ;;  %v365_v1 = vld [vmem:[#allocation5 + $0x8c8] sm:$0xff] }
  0xa0   :  { %2512 = vmatprep.subr.bf16.mxu0 %v2511_v10  ;;  %v2563_v10 = vpack.c.bf16 %v339_v3, %v338_v2  ;;  %v2533_v16 = vpack.c.bf16 %v291_v8, %v290_v7  ;;  %v346_v59 = vld [vmem:[#allocation5 + $0x830] sm:$0xff]  ;;  %v396_v2 = vld [vmem:[#allocation5 + $0x9c0] sm:$0xff]  ;;  %v397_v3 = vld [vmem:[#allocation5 + $0x9c8] sm:$0xff] }
  0xa1   :  { %2542 = vmatpush3.bf16.msra.mxu1 %v2541_v9  ;;  %v322_v9 = vld [vmem:[#allocation5 + $0x770] sm:$0xff]  ;;  %v348_v7 = vld [vmem:[#allocation5 + $0x840] sm:$0xff]  ;;  %v349_v8 = vld [vmem:[#allocation5 + $0x848] sm:$0xff] }
  0xa2   :  { %2544 = vmatprep.subr.bf16.mxu1 %v2543_v14  ;;  %v388_v14 = vld [vmem:[#allocation5 + $0x980] sm:$0xff]  ;;  %v2565_v17 = vpack.c.bf16 %v323_v11, %v322_v9  ;;  %v381_v11 = vld [vmem:[#allocation5 + $0x948] sm:$0xff] }
  0xa3   :  { %2514 = vmatpush3.bf16.msra.mxu0 %v2513_v20  ;;  %v341_v20 = vld [vmem:[#allocation5 + $0x808] sm:$0xff]  ;;  %v380_v9 = vld [vmem:[#allocation5 + $0x940] sm:$0xff] }
  0xa4   :  { %2516 = vmatprep.subr.bf16.mxu0 %v2515_v22  ;;  %v2599_v22 = vpack.c.bf16 %v389_v15, %v388_v14  ;;  %v2569_v29 = vpack.c.bf16 %v341_v20, %v340_v19  ;;  %v398_v14 = vld [vmem:[#allocation5 + $0x9d0] sm:$0xff]  ;;  %v399_v15 = vld [vmem:[#allocation5 + $0x9d8] sm:$0xff] }
  0xa5   :  { %2546 = vmatpush3.bf16.msra.mxu1 %v2545_v21  ;;  %v372_v21 = vld [vmem:[#allocation5 + $0x900] sm:$0xff]  ;;  %v350_v19 = vld [vmem:[#allocation5 + $0x850] sm:$0xff]  ;;  %v351_v20 = vld [vmem:[#allocation5 + $0x858] sm:$0xff] }
  0xa6   :  { %2548 = vmatprep.subr.bf16.mxu1 %v2547_v26  ;;  %v390_v26 = vld [vmem:[#allocation5 + $0x990] sm:$0xff]  ;;  %v2601_v31 = vpack.c.bf16 %v373_v23, %v372_v21  ;;  %v383_v23 = vld [vmem:[#allocation5 + $0x958] sm:$0xff] }
  0xa7   :  { %2518 = vmatpush3.bf16.msra.mxu0 %v2517_v32  ;;  %v2571_v32 = vpack.c.bf16 %v359_v25, %v358_v24  ;;  %v2603_v36 = vpack.c.bf16 %v391_v27, %v390_v26  ;;  %v382_v21 = vld [vmem:[#allocation5 + $0x950] sm:$0xff]  ;;  %v368_v24 = vld [vmem:[#allocation5 + $0x8e0] sm:$0xff]  ;;  %v369_v25 = vld [vmem:[#allocation5 + $0x8e8] sm:$0xff] }
  0xa8   :  { %2520 = vmatprep.subr.bf16.mxu0 %v2519_v34  ;;  %v343_v34 = vld [vmem:[#allocation5 + $0x818] sm:$0xff]  ;;  %v400_v26 = vld [vmem:[#allocation5 + $0x9e0] sm:$0xff]  ;;  %v401_v27 = vld [vmem:[#allocation5 + $0x9e8] sm:$0xff] }
  0xa9   :  { %2550 = vmatpush3.bf16.msra.mxu1 %v2549_v33  ;;  %v342_v33 = vld [vmem:[#allocation5 + $0x810] sm:$0xff] }
  0xaa   :  { %2552 = vmatprep.subr.bf16.mxu1 %v2551_v38  ;;  %v360_v38 = vld [vmem:[#allocation5 + $0x8a0] sm:$0xff]  ;;  %v2573_v43 = vpack.c.bf16 %v343_v34, %v342_v33  ;;  %v2623_v34 = vpack.c.bf16 %v401_v27, %v400_v26  ;;  %v458_v26 = vld [vmem:[#allocation5 + $0xbb0] sm:$0xff]  ;;  %v459_v27 = vld [vmem:[#allocation5 + $0xbb8] sm:$0xff] }
  0xab   :  { %2522 = vmatpush3.bf16.msra.mxu0 %v2521_v44  ;;  %v71_v44 = vld [vmem:[#allocation2 + $0x98] sm:$0xff]  ;;  %v384_v33 = vld [vmem:[#allocation5 + $0x960] sm:$0xff] }
  0xac   :  { %2524 = vmatprep.subr.bf16.mxu0 %v2523_v46  ;;  %v2575_v46 = vpack.c.bf16 %v361_v39, %v360_v38  ;;  %v402_v38 = vld [vmem:[#allocation5 + $0x9f0] sm:$0xff]  ;;  %v403_v39 = vld [vmem:[#allocation5 + $0x9f8] sm:$0xff] }
  0xad   :  { %2554 = vmatpush3.bf16.msra.mxu1 %v2553_v45  ;;  %v2605_v45 = vpack.c.bf16 %v375_v37, %v374_v35  ;;  %v385_v35 = vld [vmem:[#allocation5 + $0x968] sm:$0xff]  ;;  %v371_v37 = vld [vmem:[#allocation5 + $0x8f8] sm:$0xff] }
  0xae   :  { %2556 = vmatprep.subr.bf16.mxu1 %v2555_v50  ;;  %v2607_v50 = vpack.c.bf16 %v393_v41, %v392_v40  ;;  %v2625_v41 = vpack.c.bf16 %v385_v35, %v384_v33  ;;  %v442_v33 = vld [vmem:[#allocation5 + $0xb30] sm:$0xff]  ;;  %v443_v35 = vld [vmem:[#allocation5 + $0xb38] sm:$0xff] }
  0xaf   :  { %2526 = vmatpush3.bf16.msra.mxu0 %v2525_v56  ;;  %v2577_v56 = vpack.c.bf16 %v345_v48, %v344_v47  ;;  %v387_v47 = vld [vmem:[#allocation5 + $0x978] sm:$0xff]  ;;  %v420_v48 = vld [vmem:[#allocation5 + $0xa80] sm:$0xff] }
  0xb0   :  { %2528 = vmatprep.subr.bf16.mxu0 %v2527_v58  ;;  %v2579_v58 = vpack.c.bf16 %v363_v53, %v362_v52 }
  0xb1   :  { %2558 = vmatpush3.bf16.msra.mxu1 %v2557_v57  ;;  %v2609_v57 = vpack.c.bf16 %v377_v51, %v376_v49  ;;  %v421_v49 = vld [vmem:[#allocation5 + $0xa88] sm:$0xff] }
  0xb2   :  { %2560 = vmatprep.subr.bf16.mxu1 %v2559_v62  ;;  %v2611_v62 = vpack.c.bf16 %v395_v55, %v394_v54  ;;  %v453_v51 = vld [vmem:[#allocation5 + $0xb88] sm:$0xff]  ;;  %v2631_v54 = vpack.c.bf16 %v421_v49, %v420_v48  ;;  %v404_v55 = vld [vmem:[#allocation5 + $0xa00] sm:$0xff]  ;;  %v430_v48 = vld [vmem:[#allocation5 + $0xad0] sm:$0xff] }
  0xb3   :  { %2530 = vmatpush3.bf16.msra.mxu0 %v2529_v4  ;;  %v2581_v4 = vpack.c.bf16 %v347_v60, %v346_v59  ;;  %v437_v59 = vld [vmem:[#allocation5 + $0xb08] sm:$0xff]  ;;  %v422_v60 = vld [vmem:[#allocation5 + $0xa90] sm:$0xff]  ;;  %v431_v49 = vld [vmem:[#allocation5 + $0xad8] sm:$0xff] }
  0xb4   :  { %2532 = vmatprep.subr.bf16.mxu0 %v2531_v6  ;;  %v2583_v6 = vpack.c.bf16 %v365_v1, %v364_v0  ;;  %v68_v0 = vld [vmem:[#allocation2 + $0x80] sm:$0xff] }
  0xb5   :  { %2562 = vmatpush3.bf16.msra.mxu1 %v2561_v5  ;;  %v2613_v5 = vpack.c.bf16 %v379_v63, %v378_v61  ;;  %v423_v61 = vld [vmem:[#allocation5 + $0xa98] sm:$0xff] }
  0xb6   :  { %2564 = vmatprep.subr.bf16.mxu1 %v2563_v10  ;;  %v2615_v10 = vpack.c.bf16 %v397_v3, %v396_v2  ;;  %v455_v63 = vld [vmem:[#allocation5 + $0xb98] sm:$0xff]  ;;  %v70_v2 = vld [vmem:[#allocation2 + $0x90] sm:$0xff] }
  0xb7   :  { %2534 = vmatpush3.bf16.msra.mxu0 %v2533_v16  ;;  %v2585_v16 = vpack.c.bf16 %v349_v8, %v348_v7  ;;  %v438_v7 = vld [vmem:[#allocation5 + $0xb10] sm:$0xff] }
  0xb8   :  { %2568 = vmatprep.subr.bf16.mxu0 %v2567_v18  ;;  %v2587_v18 = vpack.c.bf16 %v367_v13, %v366_v12  ;;  %v456_v12 = vld [vmem:[#allocation5 + $0xba0] sm:$0xff]  ;;  %v457_v13 = vld [vmem:[#allocation5 + $0xba8] sm:$0xff] }
  0xb9   :  { %2566 = vmatpush3.bf16.msra.mxu1 %v2565_v17  ;;  %v2617_v17 = vpack.c.bf16 %v381_v11, %v380_v9  ;;  %v439_v9 = vld [vmem:[#allocation5 + $0xb18] sm:$0xff]  ;;  %v425_v11 = vld [vmem:[#allocation5 + $0xaa8] sm:$0xff] }
  0xba   :  { %2600 = vmatprep.subr.bf16.mxu1 %v2599_v22  ;;  %1088 = vmatmul.mubr.f32.vlgmr.msra.gmra.mrb[6].mxu0 %v64_v28  ;;  %v2619_v22 = vpack.c.bf16 %v399_v15, %v398_v14  ;;  %v2589_v28 = vpack.c.bf16 %v351_v20, %v350_v19  ;;  %v73_v14 = vld [vmem:[#allocation2 + $0xa8] sm:$0xff]  ;;  %v408_v19 = vld [vmem:[#allocation5 + $0xa20] sm:$0xff] }
  0xbb   :  { %2570 = vmatpush3.bf16.msra.mxu0 %v2569_v29  ;;  %1227 = vmatprep.mubr.f32.mxu0 %v69_v42  ;;  %v2621_v29 = vpack.c.bf16 %v383_v23, %v382_v21  ;;  %v409_v20 = vld [vmem:[#allocation5 + $0xa28] sm:$0xff]  ;;  %v440_v21 = vld [vmem:[#allocation5 + $0xb20] sm:$0xff] }
  0xbc   :  { %1158 = vmatmul.mubr.f32.vlgmr.msra.gmra.mrb[6].mxu1 %v66_v30  ;;  %2572 = vmatprep.subr.bf16.mxu0 %v2571_v32  ;;  %v2591_v30 = vpack.c.bf16 %v369_v25, %v368_v24  ;;  %v353_v32 = vld [vmem:[#allocation5 + $0x868] sm:$0xff]  ;;  %v426_v24 = vld [vmem:[#allocation5 + $0xab0] sm:$0xff]  ;;  %v427_v25 = vld [vmem:[#allocation5 + $0xab8] sm:$0xff] }
  0xbd   :  { %2602 = vmatpush3.bf16.msra.mxu1 %v2601_v31  ;;  %1297 = vmatprep.mubr.f32.mxu1 %v71_v44  ;;  %v352_v31 = vld [vmem:[#allocation5 + $0x860] sm:$0xff]  ;;  %v355_v44 = vld [vmem:[#allocation5 + $0x878] sm:$0xff]  ;;  %v441_v23 = vld [vmem:[#allocation5 + $0xb28] sm:$0xff] }
  0xbe   :  { %2604 = vmatprep.subr.bf16.mxu1 %v2603_v36  ;;  %v370_v36 = vld [vmem:[#allocation5 + $0x8f0] sm:$0xff]  ;;  %v2593_v40 = vpack.c.bf16 %v353_v32, %v352_v31  ;;  %v411_v32 = vld [vmem:[#allocation5 + $0xa38] sm:$0xff] }
  0xbf   :  { %2574 = vmatpush3.bf16.msra.mxu0 %v2573_v43  ;;  %v2595_v42 = vpack.c.bf16 %v371_v37, %v370_v36  ;;  %v354_v43 = vld [vmem:[#allocation5 + $0x870] sm:$0xff]  ;;  %v428_v36 = vld [vmem:[#allocation5 + $0xac0] sm:$0xff]  ;;  %v429_v37 = vld [vmem:[#allocation5 + $0xac8] sm:$0xff] }
  0xc0   :  { %2576 = vmatprep.subr.bf16.mxu0 %v2575_v46  ;;  %v2627_v46 = vpack.c.bf16 %v403_v39, %v402_v38  ;;  %v2597_v52 = vpack.c.bf16 %v355_v44, %v354_v43  ;;  %v410_v31 = vld [vmem:[#allocation5 + $0xa30] sm:$0xff]  ;;  %v460_v38 = vld [vmem:[#allocation5 + $0xbc0] sm:$0xff]  ;;  %v461_v39 = vld [vmem:[#allocation5 + $0xbc8] sm:$0xff] }
  0xc1   :  { %2606 = vmatpush3.bf16.msra.mxu1 %v2605_v45  ;;  %v386_v45 = vld [vmem:[#allocation5 + $0x970] sm:$0xff]  ;;  %v412_v43 = vld [vmem:[#allocation5 + $0xa40] sm:$0xff]  ;;  %v413_v44 = vld [vmem:[#allocation5 + $0xa48] sm:$0xff] }
  0xc2   :  { %2608 = vmatprep.subr.bf16.mxu1 %v2607_v50  ;;  %v452_v50 = vld [vmem:[#allocation5 + $0xb80] sm:$0xff]  ;;  %v2629_v53 = vpack.c.bf16 %v387_v47, %v386_v45  ;;  %v445_v47 = vld [vmem:[#allocation5 + $0xb48] sm:$0xff] }
  0xc3   :  { %2578 = vmatpush3.bf16.msra.mxu0 %v2577_v56  ;;  %v405_v56 = vld [vmem:[#allocation5 + $0xa08] sm:$0xff]  ;;  %v444_v45 = vld [vmem:[#allocation5 + $0xb40] sm:$0xff] }
  0xc4   :  { %2580 = vmatprep.subr.bf16.mxu0 %v2579_v58  ;;  %v2663_v58 = vpack.c.bf16 %v453_v51, %v452_v50  ;;  %v2633_v1 = vpack.c.bf16 %v405_v56, %v404_v55  ;;  %v462_v50 = vld [vmem:[#allocation5 + $0xbd0] sm:$0xff]  ;;  %v463_v51 = vld [vmem:[#allocation5 + $0xbd8] sm:$0xff] }
  0xc5   :  { %2610 = vmatpush3.bf16.msra.mxu1 %v2609_v57  ;;  %v436_v57 = vld [vmem:[#allocation5 + $0xb00] sm:$0xff]  ;;  %v414_v55 = vld [vmem:[#allocation5 + $0xa50] sm:$0xff]  ;;  %v415_v56 = vld [vmem:[#allocation5 + $0xa58] sm:$0xff] }
  0xc6   :  { %2612 = vmatprep.subr.bf16.mxu1 %v2611_v62  ;;  %v454_v62 = vld [vmem:[#allocation5 + $0xb90] sm:$0xff]  ;;  %v2665_v3 = vpack.c.bf16 %v437_v59, %v436_v57  ;;  %v447_v59 = vld [vmem:[#allocation5 + $0xb58] sm:$0xff] }
  0xc7   :  { %2582 = vmatpush3.bf16.msra.mxu0 %v2581_v4  ;;  %v2635_v4 = vpack.c.bf16 %v423_v61, %v422_v60  ;;  %v2667_v8 = vpack.c.bf16 %v455_v63, %v454_v62  ;;  %v446_v57 = vld [vmem:[#allocation5 + $0xb50] sm:$0xff]  ;;  %v432_v60 = vld [vmem:[#allocation5 + $0xae0] sm:$0xff]  ;;  %v433_v61 = vld [vmem:[#allocation5 + $0xae8] sm:$0xff] }
  0xc8   :  { %2584 = vmatprep.subr.bf16.mxu0 %v2583_v6  ;;  %v407_v6 = vld [vmem:[#allocation5 + $0xa18] sm:$0xff]  ;;  %v464_v62 = vld [vmem:[#allocation5 + $0xbe0] sm:$0xff]  ;;  %v465_v63 = vld [vmem:[#allocation5 + $0xbe8] sm:$0xff] }
  0xc9   :  { %2614 = vmatpush3.bf16.msra.mxu1 %v2613_v5  ;;  %v406_v5 = vld [vmem:[#allocation5 + $0xa10] sm:$0xff] }
  0xca   :  { %2616 = vmatprep.subr.bf16.mxu1 %v2615_v10  ;;  %v424_v10 = vld [vmem:[#allocation5 + $0xaa0] sm:$0xff]  ;;  %v2637_v15 = vpack.c.bf16 %v407_v6, %v406_v5  ;;  %v2687_v6 = vpack.c.bf16 %v465_v63, %v464_v62  ;;  %v522_v62 = vld [vmem:[#allocation5 + $0xdb0] sm:$0xff]  ;;  %v523_v63 = vld [vmem:[#allocation5 + $0xdb8] sm:$0xff] }
  0xcb   :  { %2586 = vmatpush3.bf16.msra.mxu0 %v2585_v16  ;;  %v75_v16 = vld [vmem:[#allocation2 + $0xb8] sm:$0xff]  ;;  %v448_v5 = vld [vmem:[#allocation5 + $0xb60] sm:$0xff] }
  0xcc   :  { %2588 = vmatprep.subr.bf16.mxu0 %v2587_v18  ;;  %v2639_v18 = vpack.c.bf16 %v425_v11, %v424_v10  ;;  %v466_v10 = vld [vmem:[#allocation5 + $0xbf0] sm:$0xff]  ;;  %v467_v11 = vld [vmem:[#allocation5 + $0xbf8] sm:$0xff] }
  0xcd   :  { %2618 = vmatpush3.bf16.msra.mxu1 %v2617_v17  ;;  %v2669_v17 = vpack.c.bf16 %v439_v9, %v438_v7  ;;  %v449_v7 = vld [vmem:[#allocation5 + $0xb68] sm:$0xff]  ;;  %v435_v9 = vld [vmem:[#allocation5 + $0xaf8] sm:$0xff] }
  0xce   :  { %2620 = vmatprep.subr.bf16.mxu1 %v2619_v22  ;;  %v2671_v22 = vpack.c.bf16 %v457_v13, %v456_v12  ;;  %v2689_v13 = vpack.c.bf16 %v449_v7, %v448_v5  ;;  %v506_v5 = vld [vmem:[#allocation5 + $0xd30] sm:$0xff]  ;;  %v507_v7 = vld [vmem:[#allocation5 + $0xd38] sm:$0xff] }
  0xcf   :  { %2590 = vmatpush3.bf16.msra.mxu0 %v2589_v28  ;;  %v2641_v28 = vpack.c.bf16 %v409_v20, %v408_v19  ;;  %v451_v19 = vld [vmem:[#allocation5 + $0xb78] sm:$0xff]  ;;  %v484_v20 = vld [vmem:[#allocation5 + $0xc80] sm:$0xff] }
  0xd0   :  { %2592 = vmatprep.subr.bf16.mxu0 %v2591_v30  ;;  %v2643_v30 = vpack.c.bf16 %v427_v25, %v426_v24 }
  0xd1   :  { %2622 = vmatpush3.bf16.msra.mxu1 %v2621_v29  ;;  %v2673_v29 = vpack.c.bf16 %v441_v23, %v440_v21  ;;  %v485_v21 = vld [vmem:[#allocation5 + $0xc88] sm:$0xff] }
  0xd2   :  { %2624 = vmatprep.subr.bf16.mxu1 %v2623_v34  ;;  %v2675_v34 = vpack.c.bf16 %v459_v27, %v458_v26  ;;  %v517_v23 = vld [vmem:[#allocation5 + $0xd88] sm:$0xff]  ;;  %v2695_v26 = vpack.c.bf16 %v485_v21, %v484_v20  ;;  %v468_v27 = vld [vmem:[#allocation5 + $0xc00] sm:$0xff]  ;;  %v494_v20 = vld [vmem:[#allocation5 + $0xcd0] sm:$0xff] }
  0xd3   :  { %2594 = vmatpush3.bf16.msra.mxu0 %v2593_v40  ;;  %v2645_v40 = vpack.c.bf16 %v411_v32, %v410_v31  ;;  %v501_v31 = vld [vmem:[#allocation5 + $0xd08] sm:$0xff]  ;;  %v486_v32 = vld [vmem:[#allocation5 + $0xc90] sm:$0xff]  ;;  %v495_v21 = vld [vmem:[#allocation5 + $0xcd8] sm:$0xff] }
  0xd4   :  { %2596 = vmatprep.subr.bf16.mxu0 %v2595_v42  ;;  %v2647_v42 = vpack.c.bf16 %v429_v37, %v428_v36  ;;  %v72_v36 = vld [vmem:[#allocation2 + $0xa0] sm:$0xff] }
  0xd5   :  { %2626 = vmatpush3.bf16.msra.mxu1 %v2625_v41  ;;  %v2677_v41 = vpack.c.bf16 %v443_v35, %v442_v33  ;;  %v487_v33 = vld [vmem:[#allocation5 + $0xc98] sm:$0xff] }
  0xd6   :  { %2628 = vmatprep.subr.bf16.mxu1 %v2627_v46  ;;  %v2679_v46 = vpack.c.bf16 %v461_v39, %v460_v38  ;;  %v519_v35 = vld [vmem:[#allocation5 + $0xd98] sm:$0xff]  ;;  %v74_v38 = vld [vmem:[#allocation2 + $0xb0] sm:$0xff] }
  0xd7   :  { %2598 = vmatpush3.bf16.msra.mxu0 %v2597_v52  ;;  %v2649_v52 = vpack.c.bf16 %v413_v44, %v412_v43  ;;  %v502_v43 = vld [vmem:[#allocation5 + $0xd10] sm:$0xff] }
  0xd8   :  { %2632 = vmatprep.subr.bf16.mxu0 %v2631_v54  ;;  %v2651_v54 = vpack.c.bf16 %v431_v49, %v430_v48  ;;  %v520_v48 = vld [vmem:[#allocation5 + $0xda0] sm:$0xff]  ;;  %v521_v49 = vld [vmem:[#allocation5 + $0xda8] sm:$0xff] }
  0xd9   :  { %2630 = vmatpush3.bf16.msra.mxu1 %v2629_v53  ;;  %v2681_v53 = vpack.c.bf16 %v445_v47, %v444_v45  ;;  %v503_v45 = vld [vmem:[#allocation5 + $0xd18] sm:$0xff]  ;;  %v489_v47 = vld [vmem:[#allocation5 + $0xca8] sm:$0xff] }
  0xda   :  { %2664 = vmatprep.subr.bf16.mxu1 %v2663_v58  ;;  %1228 = vmatmul.mubr.f32.vlgmr.msra.gmra.mrb[8].mxu0 %v68_v0  ;;  %v2683_v58 = vpack.c.bf16 %v463_v51, %v462_v50  ;;  %v2653_v0 = vpack.c.bf16 %v415_v56, %v414_v55  ;;  %v77_v50 = vld [vmem:[#allocation2 + $0xc8] sm:$0xff]  ;;  %v472_v55 = vld [vmem:[#allocation5 + $0xc20] sm:$0xff] }
  0xdb   :  { %2634 = vmatpush3.bf16.msra.mxu0 %v2633_v1  ;;  %1367 = vmatprep.mubr.f32.mxu0 %v73_v14  ;;  %v2685_v1 = vpack.c.bf16 %v447_v59, %v446_v57  ;;  %v473_v56 = vld [vmem:[#allocation5 + $0xc28] sm:$0xff]  ;;  %v504_v57 = vld [vmem:[#allocation5 + $0xd20] sm:$0xff] }
  0xdc   :  { %1298 = vmatmul.mubr.f32.vlgmr.msra.gmra.mrb[8].mxu1 %v70_v2  ;;  %2636 = vmatprep.subr.bf16.mxu0 %v2635_v4  ;;  %v2655_v2 = vpack.c.bf16 %v433_v61, %v432_v60  ;;  %v417_v4 = vld [vmem:[#allocation5 + $0xa68] sm:$0xff]  ;;  %v490_v60 = vld [vmem:[#allocation5 + $0xcb0] sm:$0xff]  ;;  %v491_v61 = vld [vmem:[#allocation5 + $0xcb8] sm:$0xff] }
  0xdd   :  { %2666 = vmatpush3.bf16.msra.mxu1 %v2665_v3  ;;  %1437 = vmatprep.mubr.f32.mxu1 %v75_v16  ;;  %v416_v3 = vld [vmem:[#allocation5 + $0xa60] sm:$0xff]  ;;  %v419_v16 = vld [vmem:[#allocation5 + $0xa78] sm:$0xff]  ;;  %v505_v59 = vld [vmem:[#allocation5 + $0xd28] sm:$0xff] }
  0xde   :  { %2668 = vmatprep.subr.bf16.mxu1 %v2667_v8  ;;  %v434_v8 = vld [vmem:[#allocation5 + $0xaf0] sm:$0xff]  ;;  %v2657_v12 = vpack.c.bf16 %v417_v4, %v416_v3  ;;  %v475_v4 = vld [vmem:[#allocation5 + $0xc38] sm:$0xff] }
  0xdf   :  { %2638 = vmatpush3.bf16.msra.mxu0 %v2637_v15  ;;  %v2659_v14 = vpack.c.bf16 %v435_v9, %v434_v8  ;;  %v418_v15 = vld [vmem:[#allocation5 + $0xa70] sm:$0xff]  ;;  %v492_v8 = vld [vmem:[#allocation5 + $0xcc0] sm:$0xff]  ;;  %v493_v9 = vld [vmem:[#allocation5 + $0xcc8] sm:$0xff] }
  0xe0   :  { %2640 = vmatprep.subr.bf16.mxu0 %v2639_v18  ;;  %v2691_v18 = vpack.c.bf16 %v467_v11, %v466_v10  ;;  %v2661_v24 = vpack.c.bf16 %v419_v16, %v418_v15  ;;  %v474_v3 = vld [vmem:[#allocation5 + $0xc30] sm:$0xff]  ;;  %v524_v10 = vld [vmem:[#allocation5 + $0xdc0] sm:$0xff]  ;;  %v525_v11 = vld [vmem:[#allocation5 + $0xdc8] sm:$0xff] }
  0xe1   :  { %2670 = vmatpush3.bf16.msra.mxu1 %v2669_v17  ;;  %v450_v17 = vld [vmem:[#allocation5 + $0xb70] sm:$0xff]  ;;  %v476_v15 = vld [vmem:[#allocation5 + $0xc40] sm:$0xff]  ;;  %v477_v16 = vld [vmem:[#allocation5 + $0xc48] sm:$0xff] }
  0xe2   :  { %2672 = vmatprep.subr.bf16.mxu1 %v2671_v22  ;;  %v516_v22 = vld [vmem:[#allocation5 + $0xd80] sm:$0xff]  ;;  %v2693_v25 = vpack.c.bf16 %v451_v19, %v450_v17  ;;  %v509_v19 = vld [vmem:[#allocation5 + $0xd48] sm:$0xff] }
  0xe3   :  { %2642 = vmatpush3.bf16.msra.mxu0 %v2641_v28  ;;  %v469_v28 = vld [vmem:[#allocation5 + $0xc08] sm:$0xff]  ;;  %v508_v17 = vld [vmem:[#allocation5 + $0xd40] sm:$0xff] }
  0xe4   :  { %2644 = vmatprep.subr.bf16.mxu0 %v2643_v30  ;;  %v2727_v30 = vpack.c.bf16 %v517_v23, %v516_v22  ;;  %v2697_v37 = vpack.c.bf16 %v469_v28, %v468_v27  ;;  %v526_v22 = vld [vmem:[#allocation5 + $0xdd0] sm:$0xff]  ;;  %v527_v23 = vld [vmem:[#allocation5 + $0xdd8] sm:$0xff] }
  0xe5   :  { %2674 = vmatpush3.bf16.msra.mxu1 %v2673_v29  ;;  %v500_v29 = vld [vmem:[#allocation5 + $0xd00] sm:$0xff]  ;;  %v478_v27 = vld [vmem:[#allocation5 + $0xc50] sm:$0xff]  ;;  %v479_v28 = vld [vmem:[#allocation5 + $0xc58] sm:$0xff] }
  0xe6   :  { %2676 = vmatprep.subr.bf16.mxu1 %v2675_v34  ;;  %v518_v34 = vld [vmem:[#allocation5 + $0xd90] sm:$0xff]  ;;  %v2729_v39 = vpack.c.bf16 %v501_v31, %v500_v29  ;;  %v511_v31 = vld [vmem:[#allocation5 + $0xd58] sm:$0xff] }
  0xe7   :  { %2646 = vmatpush3.bf16.msra.mxu0 %v2645_v40  ;;  %v2699_v40 = vpack.c.bf16 %v487_v33, %v486_v32  ;;  %v2731_v44 = vpack.c.bf16 %v519_v35, %v518_v34  ;;  %v510_v29 = vld [vmem:[#allocation5 + $0xd50] sm:$0xff]  ;;  %v496_v32 = vld [vmem:[#allocation5 + $0xce0] sm:$0xff]  ;;  %v497_v33 = vld [vmem:[#allocation5 + $0xce8] sm:$0xff] }
  0xe8   :  { %2648 = vmatprep.subr.bf16.mxu0 %v2647_v42  ;;  %v471_v42 = vld [vmem:[#allocation5 + $0xc18] sm:$0xff]  ;;  %v528_v34 = vld [vmem:[#allocation5 + $0xde0] sm:$0xff]  ;;  %v529_v35 = vld [vmem:[#allocation5 + $0xde8] sm:$0xff] }
  0xe9   :  { %2678 = vmatpush3.bf16.msra.mxu1 %v2677_v41  ;;  %v470_v41 = vld [vmem:[#allocation5 + $0xc10] sm:$0xff] }
  0xea   :  { %2680 = vmatprep.subr.bf16.mxu1 %v2679_v46  ;;  %v488_v46 = vld [vmem:[#allocation5 + $0xca0] sm:$0xff]  ;;  %v2701_v51 = vpack.c.bf16 %v471_v42, %v470_v41  ;;  %v2751_v42 = vpack.c.bf16 %v529_v35, %v528_v34  ;;  %v586_v34 = vld [vmem:[#allocation5 + $0xfb0] sm:$0xff]  ;;  %v587_v35 = vld [vmem:[#allocation5 + $0xfb8] sm:$0xff] }
  0xeb   :  { %2650 = vmatpush3.bf16.msra.mxu0 %v2649_v52  ;;  %v79_v52 = vld [vmem:[#allocation2 + $0xd8] sm:$0xff]  ;;  %v512_v41 = vld [vmem:[#allocation5 + $0xd60] sm:$0xff] }
  0xec   :  { %2652 = vmatprep.subr.bf16.mxu0 %v2651_v54  ;;  %v2703_v54 = vpack.c.bf16 %v489_v47, %v488_v46  ;;  %v530_v46 = vld [vmem:[#allocation5 + $0xdf0] sm:$0xff]  ;;  %v531_v47 = vld [vmem:[#allocation5 + $0xdf8] sm:$0xff] }
  0xed   :  { %2682 = vmatpush3.bf16.msra.mxu1 %v2681_v53  ;;  %v2733_v53 = vpack.c.bf16 %v503_v45, %v502_v43  ;;  %v513_v43 = vld [vmem:[#allocation5 + $0xd68] sm:$0xff]  ;;  %v499_v45 = vld [vmem:[#allocation5 + $0xcf8] sm:$0xff] }
  0xee   :  { %2684 = vmatprep.subr.bf16.mxu1 %v2683_v58  ;;  %v2735_v58 = vpack.c.bf16 %v521_v49, %v520_v48  ;;  %v2753_v49 = vpack.c.bf16 %v513_v43, %v512_v41  ;;  %v570_v41 = vld [vmem:[#allocation5 + $0xf30] sm:$0xff]  ;;  %v571_v43 = vld [vmem:[#allocation5 + $0xf38] sm:$0xff] }
  0xef   :  { %2654 = vmatpush3.bf16.msra.mxu0 %v2653_v0  ;;  %v2705_v0 = vpack.c.bf16 %v473_v56, %v472_v55  ;;  %v515_v55 = vld [vmem:[#allocation5 + $0xd78] sm:$0xff]  ;;  %v548_v56 = vld [vmem:[#allocation5 + $0xe80] sm:$0xff] }
  0xf0   :  { %2656 = vmatprep.subr.bf16.mxu0 %v2655_v2  ;;  %v2707_v2 = vpack.c.bf16 %v491_v61, %v490_v60 }
  0xf1   :  { %2686 = vmatpush3.bf16.msra.mxu1 %v2685_v1  ;;  %v2737_v1 = vpack.c.bf16 %v505_v59, %v504_v57  ;;  %v549_v57 = vld [vmem:[#allocation5 + $0xe88] sm:$0xff] }
  0xf2   :  { %2688 = vmatprep.subr.bf16.mxu1 %v2687_v6  ;;  %v2739_v6 = vpack.c.bf16 %v523_v63, %v522_v62  ;;  %v581_v59 = vld [vmem:[#allocation5 + $0xf88] sm:$0xff]  ;;  %v2759_v62 = vpack.c.bf16 %v549_v57, %v548_v56  ;;  %v532_v63 = vld [vmem:[#allocation5 + $0xe00] sm:$0xff]  ;;  %v558_v56 = vld [vmem:[#allocation5 + $0xed0] sm:$0xff] }
  0xf3   :  { %2658 = vmatpush3.bf16.msra.mxu0 %v2657_v12  ;;  %v2709_v12 = vpack.c.bf16 %v475_v4, %v474_v3  ;;  %v565_v3 = vld [vmem:[#allocation5 + $0xf08] sm:$0xff]  ;;  %v550_v4 = vld [vmem:[#allocation5 + $0xe90] sm:$0xff]  ;;  %v559_v57 = vld [vmem:[#allocation5 + $0xed8] sm:$0xff] }
  0xf4   :  { %2660 = vmatprep.subr.bf16.mxu0 %v2659_v14  ;;  %v2711_v14 = vpack.c.bf16 %v493_v9, %v492_v8  ;;  %v76_v8 = vld [vmem:[#allocation2 + $0xc0] sm:$0xff] }
  0xf5   :  { %2690 = vmatpush3.bf16.msra.mxu1 %v2689_v13  ;;  %v2741_v13 = vpack.c.bf16 %v507_v7, %v506_v5  ;;  %v551_v5 = vld [vmem:[#allocation5 + $0xe98] sm:$0xff] }
  0xf6   :  { %2692 = vmatprep.subr.bf16.mxu1 %v2691_v18  ;;  %v2743_v18 = vpack.c.bf16 %v525_v11, %v524_v10  ;;  %v583_v7 = vld [vmem:[#allocation5 + $0xf98] sm:$0xff]  ;;  %v78_v10 = vld [vmem:[#allocation2 + $0xd0] sm:$0xff] }
  0xf7   :  { %2662 = vmatpush3.bf16.msra.mxu0 %v2661_v24  ;;  %v2713_v24 = vpack.c.bf16 %v477_v16, %v476_v15  ;;  %v566_v15 = vld [vmem:[#allocation5 + $0xf10] sm:$0xff] }
  0xf8   :  { %2696 = vmatprep.subr.bf16.mxu0 %v2695_v26  ;;  %v2715_v26 = vpack.c.bf16 %v495_v21, %v494_v20  ;;  %v584_v20 = vld [vmem:[#allocation5 + $0xfa0] sm:$0xff]  ;;  %v585_v21 = vld [vmem:[#allocation5 + $0xfa8] sm:$0xff] }
  0xf9   :  { %2694 = vmatpush3.bf16.msra.mxu1 %v2693_v25  ;;  %v2745_v25 = vpack.c.bf16 %v509_v19, %v508_v17  ;;  %v567_v17 = vld [vmem:[#allocation5 + $0xf18] sm:$0xff]  ;;  %v553_v19 = vld [vmem:[#allocation5 + $0xea8] sm:$0xff] }
  0xfa   :  { %2728 = vmatprep.subr.bf16.mxu1 %v2727_v30  ;;  %1368 = vmatmul.mubr.f32.vlgmr.msra.gmra.mrb[10].mxu0 %v72_v36  ;;  %v2747_v30 = vpack.c.bf16 %v527_v23, %v526_v22  ;;  %v2717_v36 = vpack.c.bf16 %v479_v28, %v478_v27  ;;  %v81_v22 = vld [vmem:[#allocation2 + $0xe8] sm:$0xff]  ;;  %v536_v27 = vld [vmem:[#allocation5 + $0xe20] sm:$0xff] }
  0xfb   :  { %2698 = vmatpush3.bf16.msra.mxu0 %v2697_v37  ;;  %1507 = vmatprep.mubr.f32.mxu0 %v77_v50  ;;  %v2749_v37 = vpack.c.bf16 %v511_v31, %v510_v29  ;;  %v537_v28 = vld [vmem:[#allocation5 + $0xe28] sm:$0xff]  ;;  %v568_v29 = vld [vmem:[#allocation5 + $0xf20] sm:$0xff] }
  0xfc   :  { %1438 = vmatmul.mubr.f32.vlgmr.msra.gmra.mrb[10].mxu1 %v74_v38  ;;  %2700 = vmatprep.subr.bf16.mxu0 %v2699_v40  ;;  %v2719_v38 = vpack.c.bf16 %v497_v33, %v496_v32  ;;  %v481_v40 = vld [vmem:[#allocation5 + $0xc68] sm:$0xff]  ;;  %v554_v32 = vld [vmem:[#allocation5 + $0xeb0] sm:$0xff]  ;;  %v555_v33 = vld [vmem:[#allocation5 + $0xeb8] sm:$0xff] }
  0xfd   :  { %2730 = vmatpush3.bf16.msra.mxu1 %v2729_v39  ;;  %1577 = vmatprep.mubr.f32.mxu1 %v79_v52  ;;  %v480_v39 = vld [vmem:[#allocation5 + $0xc60] sm:$0xff]  ;;  %v483_v52 = vld [vmem:[#allocation5 + $0xc78] sm:$0xff]  ;;  %v569_v31 = vld [vmem:[#allocation5 + $0xf28] sm:$0xff] }
  0xfe   :  { %2732 = vmatprep.subr.bf16.mxu1 %v2731_v44  ;;  %v498_v44 = vld [vmem:[#allocation5 + $0xcf0] sm:$0xff]  ;;  %v2721_v48 = vpack.c.bf16 %v481_v40, %v480_v39  ;;  %v539_v40 = vld [vmem:[#allocation5 + $0xe38] sm:$0xff] }
  0xff   :  { %2702 = vmatpush3.bf16.msra.mxu0 %v2701_v51  ;;  %v2723_v50 = vpack.c.bf16 %v499_v45, %v498_v44  ;;  %v482_v51 = vld [vmem:[#allocation5 + $0xc70] sm:$0xff]  ;;  %v556_v44 = vld [vmem:[#allocation5 + $0xec0] sm:$0xff]  ;;  %v557_v45 = vld [vmem:[#allocation5 + $0xec8] sm:$0xff] }
 0x100   :  { %2704 = vmatprep.subr.bf16.mxu0 %v2703_v54  ;;  %v2755_v54 = vpack.c.bf16 %v531_v47, %v530_v46  ;;  %v2725_v60 = vpack.c.bf16 %v483_v52, %v482_v51  ;;  %v538_v39 = vld [vmem:[#allocation5 + $0xe30] sm:$0xff]  ;;  %v588_v46 = vld [vmem:[#allocation5 + $0xfc0] sm:$0xff]  ;;  %v589_v47 = vld [vmem:[#allocation5 + $0xfc8] sm:$0xff] }
 0x101   :  { %2734 = vmatpush3.bf16.msra.mxu1 %v2733_v53  ;;  %v514_v53 = vld [vmem:[#allocation5 + $0xd70] sm:$0xff]  ;;  %v540_v51 = vld [vmem:[#allocation5 + $0xe40] sm:$0xff]  ;;  %v541_v52 = vld [vmem:[#allocation5 + $0xe48] sm:$0xff] }
 0x102   :  { %2736 = vmatprep.subr.bf16.mxu1 %v2735_v58  ;;  %v580_v58 = vld [vmem:[#allocation5 + $0xf80] sm:$0xff]  ;;  %v2757_v61 = vpack.c.bf16 %v515_v55, %v514_v53  ;;  %v573_v55 = vld [vmem:[#allocation5 + $0xf48] sm:$0xff] }
 0x103   :  { %2706 = vmatpush3.bf16.msra.mxu0 %v2705_v0  ;;  %v533_v0 = vld [vmem:[#allocation5 + $0xe08] sm:$0xff]  ;;  %v572_v53 = vld [vmem:[#allocation5 + $0xf40] sm:$0xff] }
 0x104   :  { %2708 = vmatprep.subr.bf16.mxu0 %v2707_v2  ;;  %v2791_v2 = vpack.c.bf16 %v581_v59, %v580_v58  ;;  %v2761_v9 = vpack.c.bf16 %v533_v0, %v532_v63  ;;  %v590_v58 = vld [vmem:[#allocation5 + $0xfd0] sm:$0xff]  ;;  %v591_v59 = vld [vmem:[#allocation5 + $0xfd8] sm:$0xff] }
 0x105   :  { %2738 = vmatpush3.bf16.msra.mxu1 %v2737_v1  ;;  %v564_v1 = vld [vmem:[#allocation5 + $0xf00] sm:$0xff]  ;;  %v542_v63 = vld [vmem:[#allocation5 + $0xe50] sm:$0xff]  ;;  %v543_v0 = vld [vmem:[#allocation5 + $0xe58] sm:$0xff] }
 0x106   :  { %2740 = vmatprep.subr.bf16.mxu1 %v2739_v6  ;;  %v582_v6 = vld [vmem:[#allocation5 + $0xf90] sm:$0xff]  ;;  %v2793_v11 = vpack.c.bf16 %v565_v3, %v564_v1  ;;  %v575_v3 = vld [vmem:[#allocation5 + $0xf58] sm:$0xff] }
 0x107   :  { %2710 = vmatpush3.bf16.msra.mxu0 %v2709_v12  ;;  %v2763_v12 = vpack.c.bf16 %v551_v5, %v550_v4  ;;  %v2795_v16 = vpack.c.bf16 %v583_v7, %v582_v6  ;;  %v574_v1 = vld [vmem:[#allocation5 + $0xf50] sm:$0xff]  ;;  %v560_v4 = vld [vmem:[#allocation5 + $0xee0] sm:$0xff]  ;;  %v561_v5 = vld [vmem:[#allocation5 + $0xee8] sm:$0xff] }
 0x108   :  { %2712 = vmatprep.subr.bf16.mxu0 %v2711_v14  ;;  %v535_v14 = vld [vmem:[#allocation5 + $0xe18] sm:$0xff]  ;;  %v592_v6 = vld [vmem:[#allocation5 + $0xfe0] sm:$0xff]  ;;  %v593_v7 = vld [vmem:[#allocation5 + $0xfe8] sm:$0xff] }
 0x109   :  { %2742 = vmatpush3.bf16.msra.mxu1 %v2741_v13  ;;  %v534_v13 = vld [vmem:[#allocation5 + $0xe10] sm:$0xff] }
 0x10a   :  { %2744 = vmatprep.subr.bf16.mxu1 %v2743_v18  ;;  %v552_v18 = vld [vmem:[#allocation5 + $0xea0] sm:$0xff]  ;;  %v2765_v23 = vpack.c.bf16 %v535_v14, %v534_v13 }
 0x10b   :  { %2714 = vmatpush3.bf16.msra.mxu0 %v2713_v24  ;;  %v83_v24 = vld [vmem:[#allocation2 + $0xf8] sm:$0xff]  ;;  %v576_v13 = vld [vmem:[#allocation5 + $0xf60] sm:$0xff] }
 0x10c   :  { %2716 = vmatprep.subr.bf16.mxu0 %v2715_v26  ;;  %v2767_v26 = vpack.c.bf16 %v553_v19, %v552_v18  ;;  %v563_v18 = vld [vmem:[#allocation5 + $0xef8] sm:$0xff]  ;;  %v1750_v19 = vld [vmem:[#allocation7] ss:$0 sm:$0xff] }
 0x10d   :  { %2746 = vmatpush3.bf16.msra.mxu1 %v2745_v25  ;;  %v2797_v25 = vpack.c.bf16 %v567_v17, %v566_v15  ;;  %v2815_v15 = vpack.c.bf16 %v593_v7, %v592_v6  ;;  %v562_v17 = vld [vmem:[#allocation5 + $0xef0] sm:$0xff] }
 0x10e   :  { %2748 = vmatprep.subr.bf16.mxu1 %v2747_v30  ;;  %v2799_v30 = vpack.c.bf16 %v585_v21, %v584_v20 }
 0x10f   :  { %2718 = vmatpush3.bf16.msra.mxu0 %v2717_v36  ;;  %v2769_v36 = vpack.c.bf16 %v537_v28, %v536_v27 }
 0x110   :  { %2720 = vmatprep.subr.bf16.mxu0 %v2719_v38  ;;  %v2771_v38 = vpack.c.bf16 %v555_v33, %v554_v32 }
 0x111   :  { %2750 = vmatpush3.bf16.msra.mxu1 %v2749_v37  ;;  %v2801_v37 = vpack.c.bf16 %v569_v31, %v568_v29  ;;  %v2787_v29 = vpack.c.bf16 %v563_v18, %v562_v17  ;;  %v547_v31 = vld [vmem:[#allocation5 + $0xe78] sm:$0xff] }
 0x112   :  { %2752 = vmatprep.subr.bf16.mxu1 %v2751_v42  ;;  %v2803_v42 = vpack.c.bf16 %v587_v35, %v586_v34  ;;  %v578_v34 = vld [vmem:[#allocation5 + $0xf70] sm:$0xff]  ;;  %v579_v35 = vld [vmem:[#allocation5 + $0xf78] sm:$0xff] }
 0x113   :  { %2722 = vmatpush3.bf16.msra.mxu0 %v2721_v48  ;;  %v2773_v48 = vpack.c.bf16 %v539_v40, %v538_v39  ;;  %v80_v39 = vld [vmem:[#allocation2 + $0xe0] sm:$0xff]  ;;  %v82_v40 = vld [vmem:[#allocation2 + $0xf0] sm:$0xff] }
 0x114   :  { %2724 = vmatprep.subr.bf16.mxu0 %v2723_v50  ;;  %v2775_v50 = vpack.c.bf16 %v557_v45, %v556_v44 }
 0x115   :  { %2754 = vmatpush3.bf16.msra.mxu1 %v2753_v49  ;;  %v2805_v49 = vpack.c.bf16 %v571_v43, %v570_v41 }
 0x116   :  { %2756 = vmatprep.subr.bf16.mxu1 %v2755_v54  ;;  %v2807_v54 = vpack.c.bf16 %v589_v47, %v588_v46 }
 0x117   :  { %2726 = vmatpush3.bf16.msra.mxu0 %v2725_v60  ;;  %v2777_v60 = vpack.c.bf16 %v541_v52, %v540_v51 }
 0x118   :  { %2760 = vmatprep.subr.bf16.mxu0 %v2759_v62  ;;  %v2779_v62 = vpack.c.bf16 %v559_v57, %v558_v56 }
 0x119   :  { %2758 = vmatpush3.bf16.msra.mxu1 %v2757_v61  ;;  %v2809_v61 = vpack.c.bf16 %v573_v55, %v572_v53 }
 0x11a   :  { %2792 = vmatprep.subr.bf16.mxu1 %v2791_v2  ;;  %1508 = vmatmul.mubr.f32.vlgmr.msra.gmra.mrb[12].mxu0 %v76_v8  ;;  %v2811_v2 = vpack.c.bf16 %v591_v59, %v590_v58  ;;  %v2781_v8 = vpack.c.bf16 %v543_v0, %v542_v63 }
 0x11b   :  { %2762 = vmatpush3.bf16.msra.mxu0 %v2761_v9  ;;  %1647 = vmatprep.mubr.f32.mxu0 %v81_v22  ;;  %v2813_v9 = vpack.c.bf16 %v575_v3, %v574_v1  ;;  %v594_v22 = vld [vmem:[#allocation5 + $0xff0] sm:$0xff] }
 0x11c   :  { %1578 = vmatmul.mubr.f32.vlgmr.msra.gmra.mrb[12].mxu1 %v78_v10  ;;  %2764 = vmatprep.subr.bf16.mxu0 %v2763_v12  ;;  %v2783_v10 = vpack.c.bf16 %v561_v5, %v560_v4  ;;  %v545_v12 = vld [vmem:[#allocation5 + $0xe68] sm:$0xff] }
 0x11d   :  { %2794 = vmatpush3.bf16.msra.mxu1 %v2793_v11  ;;  %1717 = vmatprep.mubr.f32.mxu1 %v83_v24  ;;  %v544_v11 = vld [vmem:[#allocation5 + $0xe60] sm:$0xff] }
 0x11e   :  { %2796 = vmatprep.subr.bf16.mxu1 %v2795_v16  ;;  %v577_v16 = vld [vmem:[#allocation5 + $0xf68] sm:$0xff] }
 0x11f   :  { %2766 = vmatpush3.bf16.msra.mxu0 %v2765_v23  ;;  %v595_v23 = vld [vmem:[#allocation5 + $0xff8] sm:$0xff]  ;;  %v2817_v28 = vpack.c.bf16 %v577_v16, %v576_v13 }
 0x120   :  { %2768 = vmatprep.subr.bf16.mxu0 %v2767_v26  ;;  %v2785_v26 = vpack.c.bf16 %v545_v12, %v544_v11  ;;  %v2819_v33 = vpack.c.bf16 %v595_v23, %v594_v22 }
 0x121   :  { %2798 = vmatpush3.bf16.msra.mxu1 %v2797_v25 }
 0x122   :  { %2800 = vmatprep.subr.bf16.mxu1 %v2799_v30  ;;  %v546_v30 = vld [vmem:[#allocation5 + $0xe70] sm:$0xff] }
 0x123   :  { %2770 = vmatpush3.bf16.msra.mxu0 %v2769_v36 }
 0x124   :  { %2772 = vmatprep.subr.bf16.mxu0 %v2771_v38  ;;  %v2821_v38 = vpack.c.bf16 %v579_v35, %v578_v34 }
 0x125   :  { %2802 = vmatpush3.bf16.msra.mxu1 %v2801_v37  ;;  %v2789_v37 = vpack.c.bf16 %v547_v31, %v546_v30 }
 0x126   :  { %2804 = vmatprep.subr.bf16.mxu1 %v2803_v42 }
 0x127   :  { %2774 = vmatpush3.bf16.msra.mxu0 %v2773_v48 }
 0x128   :  { %2776 = vmatprep.subr.bf16.mxu0 %v2775_v50 }
 0x129   :  { %2806 = vmatpush3.bf16.msra.mxu1 %v2805_v49 }
 0x12a   :  { %2808 = vmatprep.subr.bf16.mxu1 %v2807_v54 }
 0x12b   :  { %2778 = vmatpush3.bf16.msra.mxu0 %v2777_v60 }
 0x12c   :  { %2780 = vmatprep.subr.bf16.mxu0 %v2779_v62 }
 0x12d   :  { %2810 = vmatpush3.bf16.msra.mxu1 %v2809_v61  ;;  %v1783_v14 = vpop.f32.mrb[0].mxu0 }
 0x12e   :  { %2812 = vmatprep.subr.bf16.mxu1 %v2811_v2  ;;  %v1784_v20 = vpop.f32.mrb[1].mxu0 }
 0x12f   :  { %v1818_v21 = vpop.f32.mrb[0].mxu1  ;;  %v1785_v24 = vadd.f32 %v1784_v20, %v1783_v14  ;;  %2782 = vmatpush3.bf16.msra.mxu0 %v2781_v8 }
 0x130   :  { %v1819_v25 = vpop.f32.mrb[1].mxu1  ;;  %2784 = vmatprep.subr.bf16.mxu0 %v2783_v10 }
 0x131   :  { %v1820_v27 = vadd.f32 %v1819_v25, %v1818_v21  ;;  %2814 = vmatpush3.bf16.msra.mxu1 %v2813_v9  ;;  %v670_v32 = vadd.f32 %v1785_v24, %v1750_v19 }
 0x132   :  { %2816 = vmatprep.subr.bf16.mxu1 %v2815_v15 }
 0x133   :  { %v740_v36 = vadd.f32 %v1820_v27, %v670_v32  ;;  %2786 = vmatpush3.bf16.msra.mxu0 %v2785_v26 }
 0x134   :  { %2788 = vmatprep.subr.bf16.mxu0 %v2787_v29 }
 0x135   :  { %2818 = vmatpush3.bf16.msra.mxu1 %v2817_v28 }
 0x136   :  { %2820 = vmatprep.subr.bf16.mxu1 %v2819_v33 }
 0x137   :  { %2790 = vmatpush3.bf16.msra.mxu0 %v2789_v37 }
 0x139   :  { %2822 = vmatpush3.bf16.msra.mxu1 %v2821_v38 }
 0x13a   :  { %1648 = vmatmul.mubr.f32.vlgmr.msra.gmra.mrb[14].mxu0 %v80_v39 }
 0x13c   :  { %1718 = vmatmul.mubr.f32.vlgmr.msra.gmra.mrb[14].mxu1 %v82_v40 }
 0x14d   :  { %v1853_v41 = vpop.f32.mrb[2].mxu0 }
 0x14e   :  { %v1854_v42 = vpop.f32.mrb[3].mxu0 }
 0x14f   :  { %v1888_v43 = vpop.f32.mrb[2].mxu1  ;;  %v1855_v44 = vadd.f32 %v1854_v42, %v1853_v41 }
 0x150   :  { %v1889_v45 = vpop.f32.mrb[3].mxu1 }
 0x151   :  { %v1890_v46 = vadd.f32 %v1889_v45, %v1888_v43  ;;  %v810_v47 = vadd.f32 %v1855_v44, %v740_v36 }
 0x153   :  { %v880_v48 = vadd.f32 %v1890_v46, %v810_v47 }
 0x16d   :  { %v1923_v49 = vpop.f32.mrb[4].mxu0 }
 0x16e   :  { %v1924_v50 = vpop.f32.mrb[5].mxu0 }
 0x16f   :  { %v1958_v51 = vpop.f32.mrb[4].mxu1  ;;  %v1925_v52 = vadd.f32 %v1924_v50, %v1923_v49 }
 0x170   :  { %v1959_v53 = vpop.f32.mrb[5].mxu1 }
 0x171   :  { %v1960_v54 = vadd.f32 %v1959_v53, %v1958_v51  ;;  %v950_v55 = vadd.f32 %v1925_v52, %v880_v48 }
 0x173   :  { %v1020_v56 = vadd.f32 %v1960_v54, %v950_v55 }
 0x18d   :  { %v1993_v57 = vpop.f32.mrb[6].mxu0 }
 0x18e   :  { %v1994_v58 = vpop.f32.mrb[7].mxu0 }
 0x18f   :  { %v2028_v59 = vpop.f32.mrb[6].mxu1  ;;  %v1995_v60 = vadd.f32 %v1994_v58, %v1993_v57 }
 0x190   :  { %v2029_v61 = vpop.f32.mrb[7].mxu1 }
 0x191   :  { %v2030_v62 = vadd.f32 %v2029_v61, %v2028_v59  ;;  %v1090_v63 = vadd.f32 %v1995_v60, %v1020_v56 }
 0x193   :  { %v1160_v0 = vadd.f32 %v2030_v62, %v1090_v63 }
 0x1ad   :  { %v2063_v1 = vpop.f32.mrb[8].mxu0 }
 0x1ae   :  { %v2064_v2 = vpop.f32.mrb[9].mxu0 }
 0x1af   :  { %v2098_v3 = vpop.f32.mrb[8].mxu1  ;;  %v2065_v4 = vadd.f32 %v2064_v2, %v2063_v1 }
 0x1b0   :  { %v2099_v5 = vpop.f32.mrb[9].mxu1 }
 0x1b1   :  { %v2100_v6 = vadd.f32 %v2099_v5, %v2098_v3  ;;  %v1230_v7 = vadd.f32 %v2065_v4, %v1160_v0 }
 0x1b3   :  { %v1300_v8 = vadd.f32 %v2100_v6, %v1230_v7 }
 0x1cd   :  { %v2133_v9 = vpop.f32.mrb[10].mxu0 }
 0x1ce   :  { %v2134_v10 = vpop.f32.mrb[11].mxu0 }
 0x1cf   :  { %v2168_v11 = vpop.f32.mrb[10].mxu1  ;;  %v2135_v12 = vadd.f32 %v2134_v10, %v2133_v9 }
 0x1d0   :  { %v2169_v13 = vpop.f32.mrb[11].mxu1 }
 0x1d1   :  { %v2170_v14 = vadd.f32 %v2169_v13, %v2168_v11  ;;  %v1370_v15 = vadd.f32 %v2135_v12, %v1300_v8 }
 0x1d3   :  { %v1440_v16 = vadd.f32 %v2170_v14, %v1370_v15 }
 0x1ed   :  { %v2203_v17 = vpop.f32.mrb[12].mxu0 }
 0x1ee   :  { %v2204_v18 = vpop.f32.mrb[13].mxu0 }
 0x1ef   :  { %v2238_v19 = vpop.f32.mrb[12].mxu1  ;;  %v2205_v20 = vadd.f32 %v2204_v18, %v2203_v17 }
 0x1f0   :  { %v2239_v21 = vpop.f32.mrb[13].mxu1 }
 0x1f1   :  { %v2240_v22 = vadd.f32 %v2239_v21, %v2238_v19  ;;  %v1510_v23 = vadd.f32 %v2205_v20, %v1440_v16 }
 0x1f3   :  { %v1580_v24 = vadd.f32 %v2240_v22, %v1510_v23 }
 0x20d   :  { %v2273_v25 = vpop.f32.mrb[14].mxu0 }
 0x20e   :  { %v2274_v26 = vpop.f32.mrb[15].mxu0 }
 0x20f   :  { %v2308_v27 = vpop.f32.mrb[14].mxu1  ;;  %v2275_v28 = vadd.f32 %v2274_v26, %v2273_v25 }
 0x210   :  { %v2309_v29 = vpop.f32.mrb[15].mxu1 }
 0x211   :  { %v2310_v30 = vadd.f32 %v2309_v29, %v2308_v27  ;;  %v1650_v31 = vadd.f32 %v2275_v28, %v1580_v24 }
 0x213   :  { %v1720_v32 = vadd.f32 %v2310_v30, %v1650_v31 }
 0x215   :  { %v1724_v33 = vand.u32 2147483647, %v1720_v32  ;;  %v1723_v39 = vmax.f32 %v1720_v32, 0.0 }
 0x217   :  { %v1725_v34 = vsub.f32 0.0, %v1724_v33 }
 0x219   :  { %v1726_v35 = vmul.f32 1.442695, %v1725_v34 }
 0x21b   :  { %2829 = vpow2.f32 %v1726_v35 }
 0x225   :  { %v2830_v36 = vpop.eup %2829 }
 0x226   :  { %v1728_v37 = vadd.f32 1.0, %v2830_v36 }
 0x228   :  { %2831 = vlog2.f32 %v1728_v37 }
 0x232   :  { %v2832_v38 = vpop.eup %2831 }
 0x233   :  { %v1730_v40 = vmul.f32 0.6931472, %v2832_v38 }
 0x235   :  { %v1731_v41 = vadd.f32 %v1730_v40, %v1723_v39 }
 0x237   :  { %v1732_v42 = vsub.f32 0.0, %v1731_v41 }
 0x239   :  { %1733 = vst [vmem:[#allocation8] sm:$0xff] %v1732_v42 }
 0x23a   :  { %2910 = shalt.err (!%p2907_p0)
}
 0x23b   :  { %s2911_s26 = scalar_lea.hbm %s3004_s3, 128 }
 0x23c   :  { %p2912_p1 = scmp.ne.s32.totalorder %s3004_s3, %s2911_s26  ;;  %p2915_p2 = scmp.lt.u32.totalorder %s2911_s26, %s3004_s3 }
 0x23e   :  { %p2917_p3 = pnand %p2915_p2, %p2912_p1 }
 0x240   :  { %2920 = shalt.err (!%p2917_p3)
}
 0x241   :  { %1743 = dma.vmem_to_hbm [thread:$0]  %s1741_s22, 128, %s3004_s3, [#allocation4]  }
 0x242   :  { %2925 = dma.done.wait [#allocation4], 128  }
 0x243   :  { %2926 = vsyncadd [#allocation4], 4294967168 }
 0x244   :  { %1747 = vsyncpa [#allocation3], 1 }
 0x245   :  { %1748 = vsyncpa [#allocation6], 1 }
 0x246   :  { %1749 = vsyncpa [#allocation4], 1 }

</bundles_post_ra>
